<compile_context>
chip_gen: v6e
topology: v6e:2x2x1
jax: 0.10.0
libtpu: 0.0.40
codegen_flags: <defaults>
</compile_context>

<pallas_src>
import functools

import jax
import jax.numpy as jnp
from jax.experimental import pallas as pl
from jax.experimental.pallas import tpu as pltpu


# --------------------------- small helpers ----------------------------------

def _mxu_dot(a, b):
    """MXU matmul: bf16 operands (no-op cast if already bf16), f32 accumulation."""
    return jnp.dot(a.astype(jnp.bfloat16), b.astype(jnp.bfloat16),
                   preferred_element_type=jnp.float32)


def _dot_last(a, b):
    """Contract last dims of a[m, k] and b[n, k] -> [m, n] (f32 accumulation)."""
    return jax.lax.dot_general(a, b, (((1,), (1,)), ((), ())),
                               preferred_element_type=jnp.float32)


def _leaky(x, slope=0.2):
    return jnp.where(x > 0.0, x, slope * x)


def _pick_dst_tile(n_dst, pref):
    """Largest multiple-of-8 divisor of n_dst that is <= pref (falls back to n_dst)."""
    if n_dst % 8 != 0:
        return n_dst
    t = (min(pref, n_dst) // 8) * 8
    while t > 8 and n_dst % t != 0:
        t -= 8
    return t if (t > 0 and n_dst % t == 0) else n_dst


def _vmem_limit_bytes(block_bytes):
    """Shape-derived VMEM limit with headroom, capped at 3/4 physical VMEM (v7x = 64 MiB)."""
    cap = 96 * 1024 * 1024
    try:
        cap = min(cap, (pltpu.get_tpu_info().vmem_capacity_bytes * 3) // 4)
    except Exception:
        pass
    return int(max(32 * 1024 * 1024, min(4 * block_bytes + (4 << 20), cap)))


# --------------------------- fused per-(layer, dst-type) kernel --------------

def _htgnn_layer_kernel(*refs, hidden, use_update, with_scores):
    (adj_ref, xsrc_ref, wconv_ref, asrcw_ref, bconv_ref,
     xdst_ref, semw_ref, linw_ref, vecs_ref) = refs[:9]
    pos = 9
    if use_update:
        hprev_ref, gruw_ref, grub_ref = refs[pos], refs[pos + 1], refs[pos + 2]
        pos += 3
    if with_scores:
        spost_ref = refs[pos]
        pos += 1
    out_ref = refs[pos]
    acc_ref, m_ref, den_ref = refs[pos + 1], refs[pos + 2], refs[pos + 3]

    h = hidden
    r = pl.program_id(1)
    n_rel = pl.num_programs(1)

    # ---- per-relation single-head GAT; attention vectors folded into the weights ----
    adj = adj_ref[0]                                 # (TM, Ns) bf16 edge multiplicities
    x_src = xsrc_ref[0]                              # (Ns, C)  bf16
    w_aug = wconv_ref[0]                             # (C, H+1) bf16: [W | W @ a_dst^T]
    z_full = _mxu_dot(x_src, w_aug)                  # (Ns, H+1) f32
    zd_full = _mxu_dot(xdst_ref[...], w_aug)         # (TM, H+1) f32
    z_src = z_full[:, :h]                            # (Ns, H)
    alpha_dst = zd_full[:, h:h + 1]                  # (TM, 1)
    alpha_src = _dot_last(asrcw_ref[0], x_src)       # (1, Ns) = (x_src @ (W @ a_src^T))^T
    logits = _leaky(alpha_dst + alpha_src)           # (TM, Ns)
    masked = jnp.where(adj > 0, logits, -1e30)
    row_max = jnp.max(masked, axis=-1, keepdims=True)
    p = adj * jnp.exp(masked - row_max)              # multiplicity-weighted numerator (f32)
    den = jnp.sum(p, axis=-1, keepdims=True)
    attn = p / jnp.maximum(den, 1e-20)               # exact normalisation (no approx recip)
    z_rel = _mxu_dot(attn, z_src) + bconv_ref[0]     # (TM, H)

    # ---- semantic-attention score (HAN-style mean-pooled GATv2); q-contraction on VPU/XLU
    t = _leaky(_mxu_dot(z_rel, semw_ref[...]) + vecs_ref[0:1, :])
    s_node = jnp.sum(t * vecs_ref[1:2, :], axis=-1, keepdims=True)         # (TM, 1)
    s = jnp.sum(s_node, axis=0, keepdims=True) * (1.0 / s_node.shape[0])   # (1, 1)

    # ---- online softmax over relations: VMEM-resident accumulator, no HBM round-trips ----
    @pl.when(r == 0)
    def _init():
        m_ref[...] = s
        den_ref[...] = jnp.ones((1, 1), jnp.float32)
        acc_ref[...] = z_rel

    @pl.when(r > 0)
    def _accumulate():
        m_old = m_ref[...]
        m_new = jnp.maximum(m_old, s)
        scale = jnp.exp(m_old - m_new)
        wgt = jnp.exp(s - m_new)
        den_ref[...] = den_ref[...] * scale + wgt
        acc_ref[...] = acc_ref[...] * scale + wgt * z_rel
        m_ref[...] = m_new

    # ---- finalize: semantic aggregate + temporal GRU + skip blend (+ folded post head) ----
    @pl.when(r == n_rel - 1)
    def _finalize():
        out = acc_ref[...] / den_ref[...]
        if use_update:
            ob = out.astype(jnp.bfloat16)
            hb = hprev_ref[...]                      # bf16
            hp = hb.astype(jnp.float32)
            # packed per-gate weights -> lane-aligned matmuls (rows: ih r,z,n | hh r,z,n)
            r_g = jax.nn.sigmoid(_mxu_dot(ob, gruw_ref[0]) + _mxu_dot(hb, gruw_ref[3])
                                 + grub_ref[0:1, :])
            z_g = jax.nn.sigmoid(_mxu_dot(ob, gruw_ref[1]) + _mxu_dot(hb, gruw_ref[4])
                                 + grub_ref[1:2, :])
            n_g = jnp.tanh(_mxu_dot(ob, gruw_ref[2]) + grub_ref[2:3, :]
                           + r_g * (_mxu_dot(hb, gruw_ref[5]) + grub_ref[3:4, :]))
            upd = (1.0 - z_g) * n_g + z_g * hp
        else:
            upd = out
        x_lin = _mxu_dot(xdst_ref[...], linw_ref[...]) + vecs_ref[2:3, :]
        dlt = vecs_ref[3:4, :]                       # delta broadcast row
        cur = dlt * upd + (1.0 - dlt) * x_lin
        out_ref[:, :h] = cur.astype(out_ref.dtype)
        if with_scores:
            # folded  sum(post(concat(head, tail)), -1)  head: per-node [H, 2] projection,
            # written into the same lane-dense output block as the embedding.
            sc = _mxu_dot(cur, spost_ref[...])
            out_ref[:, h:] = sc.astype(out_ref.dtype)


def htgnn_layer(adj_stack, xsrc_stack, x_dst, conv_w_aug, conv_asrcw, conv_b,
                sem_w, lin_w, vecs, h_prev=None, gru_w=None, gru_b=None, s_post=None,
                *, hidden, use_update, with_scores, dst_tile=256):
    n_rel, n_dst, n_src = adj_stack.shape
    c = x_dst.shape[-1]
    h = hidden
    n_sc = int(s_post.shape[-1]) if with_scores else 0

    tm = _pick_dst_tile(n_dst, dst_tile)
    n_tiles = n_dst // tm

    in_specs = [
        pl.BlockSpec((1, tm, n_src), lambda d, r: (r, d, 0)),    # adjacency (bf16)
        pl.BlockSpec((1, n_src, c), lambda d, r: (r, 0, 0)),     # stacked src features (bf16)
        pl.BlockSpec((1, c, h + 1), lambda d, r: (r, 0, 0)),     # [W | W @ a_dst^T] (bf16)
        pl.BlockSpec((1, 1, c), lambda d, r: (r, 0, 0)),         # (W @ a_src^T)^T  (bf16)
        pl.BlockSpec((1, 1, h), lambda d, r: (r, 0, 0)),         # GAT bias (f32)
        pl.BlockSpec((tm, c), lambda d, r: (d, 0)),              # dst features (bf16)
        pl.BlockSpec((h, h), lambda d, r: (0, 0)),               # semantic attention W (bf16)
        pl.BlockSpec((c, h), lambda d, r: (0, 0)),               # skip linear W (bf16)
        pl.BlockSpec((4, h), lambda d, r: (0, 0)),               # [sem_b; sem_q; lin_b; delta]
    ]
    args = [adj_stack, xsrc_stack, conv_w_aug, conv_asrcw, conv_b,
            x_dst, sem_w, lin_w, vecs]
    if use_update:
        in_specs += [
            pl.BlockSpec((tm, h), lambda d, r: (d, 0)),          # previous snapshot state
            pl.BlockSpec((6, h, h), lambda d, r: (0, 0, 0)),     # GRU weights (ih|hh, r/z/n)
            pl.BlockSpec((4, h), lambda d, r: (0, 0)),           # GRU biases
        ]
        args += [h_prev, gru_w, gru_b]
    if with_scores:
        in_specs.append(pl.BlockSpec((h, n_sc), lambda d, r: (0, 0)))   # folded post head
        args.append(s_post)

    out_w = h + n_sc
    out_shape = jax.ShapeDtypeStruct((n_dst, out_w), jnp.float32)
    out_spec = pl.BlockSpec((tm, out_w), lambda d, r: (d, 0))

    # rough per-step VMEM working-set estimate (bytes; streams double-buffered)
    est = (2 * (tm * n_src * 2 + n_src * c * 2 + c * (h + 1) * 2 + c * 2 + h * 4
                + tm * out_w * 4)
           + tm * c * 2 + h * h * 2 + c * h * 2 + 4 * h * 4
           + (tm * h * 2 + 6 * h * h * 2 + 4 * h * 4 if use_update else 0)
           + (h * n_sc * 2 if with_scores else 0)
           + tm * h * 4 + 1024)

    kernel = functools.partial(_htgnn_layer_kernel, hidden=h,
                               use_update=use_update, with_scores=with_scores)
    return pl.pallas_call(
        kernel,
        out_shape=out_shape,
        grid=(n_tiles, n_rel),
        in_specs=in_specs,
        out_specs=out_spec,
        scratch_shapes=[
            pltpu.VMEM((tm, h), jnp.float32),   # semantic-softmax accumulator
            pltpu.VMEM((1, 1), jnp.float32),    # running max over relation scores
            pltpu.VMEM((1, 1), jnp.float32),    # running softmax denominator
        ],
        compiler_params=pltpu.CompilerParams(
            # dst tiles are independent ("parallel"); the relation axis carries the
            # resident accumulator -> reduction semantics ("arbitrary", innermost).
            dimension_semantics=("parallel", "arbitrary"),
            vmem_limit_bytes=_vmem_limit_bytes(est),
        ),
    )(*args)


# --------------------------- graph preprocessing (hoisted) -------------------

def group_by_dst(metadata):
    groups = {}
    for et in metadata[1]:
        groups.setdefault(et[2], []).append(et)
    return groups


def build_graph_structs(metadata, num_nodes, edge_index_dict):
    """Built ONCE per graph topology: per-dst-type stacks of dense relation adjacencies
    (rows = dst nodes, cols = src nodes, values = multiplicity), stored in bf16."""
    structs = {}
    for dst, rels in group_by_dst(metadata).items():
        n_dst = num_nodes[dst]
        n_src_max = max(num_nodes[et[0]] for et in rels)
        adj = jnp.zeros((len(rels), n_dst, n_src_max), jnp.bfloat16)
        for k, et in enumerate(rels):
            ei = edge_index_dict[et]
            adj = adj.at[k, ei[1], ei[0]].add(1.0)
        structs[dst] = {"rels": rels, "adj": adj, "n_src_max": n_src_max}
    return structs


# --------------------------- parameter setup --------------------------------

def init_params(key, metadata, in_channels, hidden1, hidden2):
    node_types, _ = metadata
    groups = group_by_dst(metadata)
    keys = iter(jax.random.split(key, 512))

    def nxt():
        return next(keys)

    def dense(fin, fout):
        w = jax.random.normal(nxt(), (fin, fout), jnp.float32) / jnp.sqrt(float(fin))
        b = jax.random.normal(nxt(), (1, fout), jnp.float32) * 0.01
        return w, b

    def gat_params(n_rel, c_in, h):
        ws, a_s, a_d, bs = [], [], [], []
        for _ in range(n_rel):
            w, b = dense(c_in, h)
            ws.append(w)
            bs.append(b)
            a_s.append(jax.random.normal(nxt(), (1, h), jnp.float32) / jnp.sqrt(float(h)))
            a_d.append(jax.random.normal(nxt(), (1, h), jnp.float32) / jnp.sqrt(float(h)))
        return {"w": jnp.stack(ws), "a_src": jnp.stack(a_s),
                "a_dst": jnp.stack(a_d), "b": jnp.stack(bs)}

    def sem_params(h):
        w, b = dense(h, h)
        q = jax.random.normal(nxt(), (1, h), jnp.float32) / jnp.sqrt(float(h))
        return {"w": w, "b": b, "q": q}

    def gru_params(h):
        wih, whh, bih, bhh = [], [], [], []
        for _ in range(3):                       # gate order: r, z, n
            wi, bi = dense(h, h)
            wh, bh = dense(h, h)
            wih.append(wi); bih.append(bi); whh.append(wh); bhh.append(bh)
        return {"w_ih": jnp.stack(wih), "w_hh": jnp.stack(whh),
                "b_ih": jnp.stack(bih), "b_hh": jnp.stack(bhh)}

    params = {
        "conv1": {d: gat_params(len(r), in_channels, hidden1) for d, r in groups.items()},
        "conv2": {d: gat_params(len(r), hidden1, hidden2) for d, r in groups.items()},
        "sem1": sem_params(hidden1),
        "sem2": sem_params(hidden2),
        "upd1": {nt: gru_params(hidden1) for nt in node_types},
        "upd2": {nt: gru_params(hidden2) for nt in node_types},
        "delta1": jnp.full((1, 1), 0.6, jnp.float32),
        "delta2": jnp.full((1, 1), 0.6, jnp.float32),
    }
    lw1, lb1 = dense(in_channels, hidden1)
    lw2, lb2 = dense(hidden1, hidden2)
    params["lin1"] = {"w": lw1, "b": lb1}
    params["lin2"] = {"w": lw2, "b": lb2}
    wp, bp = dense(2 * hidden2, 2)
    # Fold  sum(post(concat(head, tail)), -1)
    #   ==  head @ Wp[:h2].sum(-1) + tail @ Wp[h2:].sum(-1) + b.sum()
    w_sum = jnp.sum(wp, axis=1)                                          # (2*hidden2,)
    params["s_post"] = jnp.stack([w_sum[:hidden2], w_sum[hidden2:]], axis=1)  # (hidden2, 2)
    params["b_post_sum"] = jnp.sum(bp)
    params["post"] = {"w": wp, "b": bp}
    return params


def prepare_params(params, metadata):
    """Fold / pack / pre-cast weights ONCE (hoisted out of forward)."""
    groups = group_by_dst(metadata)

    def fold_conv(conv_p):
        w = conv_p["w"]                                              # (R, C, H)
        col_dst = jnp.einsum("rch,rkh->rck", w, conv_p["a_dst"])     # (R, C, 1)
        w_aug = jnp.concatenate([w, col_dst], axis=-1).astype(jnp.bfloat16)   # (R, C, H+1)
        asrcw = jnp.einsum("rch,rkh->rkc", w, conv_p["a_src"]).astype(jnp.bfloat16)  # (R,1,C)
        return w_aug, asrcw, conv_p["b"].astype(jnp.float32)

    def pack_gru(g):
        w = jnp.concatenate([g["w_ih"], g["w_hh"]], axis=0).astype(jnp.bfloat16)   # (6, H, H)
        b = jnp.concatenate([g["b_ih"][0] + g["b_hh"][0],            # r gate bias sum
                             g["b_ih"][1] + g["b_hh"][1],            # z gate bias sum
                             g["b_ih"][2],                           # n gate ih bias
                             g["b_hh"][2]], axis=0).astype(jnp.float32)            # (4, H)
        return w, b

    prep = {}
    for lidx, ck, sk, uk, lk, dk in ((1, "conv1", "sem1", "upd1", "lin1", "delta1"),
                                     (2, "conv2", "sem2", "upd2", "lin2", "delta2")):
        h = params[lk]["w"].shape[1]
        dst_prep = {}
        for dst in groups:
            w_aug, asrcw, b = fold_conv(params[ck][dst])
            gw, gb = pack_gru(params[uk][dst])
            dst_prep[dst] = {"w_aug": w_aug, "asrcw": asrcw, "b": b,
                             "gru_w": gw, "gru_b": gb}
        vecs = jnp.concatenate([params[sk]["b"], params[sk]["q"], params[lk]["b"],
                                jnp.broadcast_to(params[dk], (1, h))],
                               axis=0).astype(jnp.float32)             # (4, H)
        prep[lidx] = {"dst": dst_prep,
                      "sem_w": params[sk]["w"].astype(jnp.bfloat16),
                      "lin_w": params[lk]["w"].astype(jnp.bfloat16),
                      "vecs": vecs,
                      "hidden": h}
    prep[2]["s_post"] = params["s_post"].astype(jnp.bfloat16)
    return prep


# --------------------------- forward pass ------------------------------------

def forward(params, prep, metadata, num_nodes, graph, x_dict, edge_label_index_dict,
            snap, past_out_dict_1=None, past_out_dict_2=None, dst_tile=256):
    _, edge_types = metadata
    use_update = snap != 0

    def run_layer(lp, feats, past_dict, with_scores):
        h = lp["hidden"]
        feats_b = {nt: v.astype(jnp.bfloat16) for nt, v in feats.items()}
        out = {}
        for dst, st in graph.items():
            dp = lp["dst"][dst]
            # stack (and N-pad) per-relation source features -- cheap XLA glue, bf16 stream
            xsrc = jnp.stack(
                [jnp.pad(feats_b[et[0]],
                         ((0, st["n_src_max"] - feats_b[et[0]].shape[0]), (0, 0)))
                 for et in st["rels"]], axis=0)
            kw = {}
            if use_update:
                kw.update(h_prev=past_dict[dst].astype(jnp.bfloat16),
                          gru_w=dp["gru_w"], gru_b=dp["gru_b"])
            if with_scores:
                kw["s_post"] = lp["s_post"]
            out[dst] = htgnn_layer(st["adj"], xsrc, feats_b[dst],
                                   dp["w_aug"], dp["asrcw"], dp["b"],
                                   lp["sem_w"], lp["lin_w"], lp["vecs"],
                                   hidden=h, use_update=use_update,
                                   with_scores=with_scores, dst_tile=dst_tile, **kw)
        return out

    cur1 = run_layer(prep[1], x_dict, past_out_dict_1, with_scores=False)
    out2 = run_layer(prep[2], cur1, past_out_dict_2, with_scores=True)

    h2 = prep[2]["hidden"]
    cur2 = {nt: v[:, :h2] for nt, v in out2.items()}
    node_scores = {nt: v[:, h2:] for nt, v in out2.items()}

    # Link scoring on current_dict_2: the (2*h2 -> 2 -> sum) post head was folded into
    # per-node projections inside the fused layer-2 kernel; per edge type only a
    # gather + add remains (XLA glue).
    h_dict = {}
    for et in edge_types:
        src, _, dst = et
        eli = edge_label_index_dict[et]
        h_dict[et] = (node_scores[src][eli[0], 0]
                      + node_scores[dst][eli[1], 1]
                      + params["b_post_sum"])
    return h_dict, cur1, cur2


# --------------------------- demo -------------------------------------------

if __name__ == "__main__":
    key = jax.random.PRNGKey(0)
    node_types = ("user", "item")
    edge_types = (("user", "rates", "item"),
                  ("user", "clicks", "item"),
                  ("item", "rev_rates", "user"),
                  ("item", "rev_clicks", "user"))
    metadata = (node_types, edge_types)
    num_nodes = {"user": 48, "item": 64}
    in_channels = 16
    hidden_conv_1, hidden_conv_2 = 32, 16
    n_msg_edges, n_label_edges = 128, 8

    kx, ke, kl, kp = jax.random.split(key, 4)
    x_dict = {nt: jax.random.normal(jax.random.fold_in(kx, i),
                                    (num_nodes[nt], in_channels), jnp.float32)
              for i, nt in enumerate(node_types)}
    edge_index_dict, edge_label_index_dict = {}, {}
    for i, et in enumerate(edge_types):
        src, _, dst = et
        k1, k2 = jax.random.split(jax.random.fold_in(ke, i))
        edge_index_dict[et] = jnp.stack([
            jax.random.randint(k1, (n_msg_edges,), 0, num_nodes[src]),
            jax.random.randint(k2, (n_msg_edges,), 0, num_nodes[dst])])
        k3, k4 = jax.random.split(jax.random.fold_in(kl, i))
        edge_label_index_dict[et] = jnp.stack([
            jax.random.randint(k3, (n_label_edges,), 0, num_nodes[src]),
            jax.random.randint(k4, (n_label_edges,), 0, num_nodes[dst])])

    params = init_params(kp, metadata, in_channels, hidden_conv_1, hidden_conv_2)
    prep = prepare_params(params, metadata)                       # folded/packed/bf16, once
    graph = build_graph_structs(metadata, num_nodes, edge_index_dict)   # once per topology

    # snap == 0 : no temporal update (GRU / h_prev operands not even passed)
    h_dict0, cur1, cur2 = forward(params, prep, metadata, num_nodes, graph, x_dict,
                                  edge_label_index_dict, snap=0)
    # snap == 1 : temporal update against the snap-0 state (exercises the GRU path)
    h_dict1, cur1, cur2 = forward(params, prep, metadata, num_nodes, graph, x_dict,
                                  edge_label_index_dict, snap=1,
                                  past_out_dict_1=cur1, past_out_dict_2=cur2)

    jax.block_until_ready(jax.tree_util.tree_leaves((h_dict0, h_dict1, cur1, cur2)))
    print("KERNEL_OK")
</pallas_src>

<mosaic_0001>
module attributes {stable_mosaic.version = 11 : i64} {
  func.func @_htgnn_layer_kernel(%arg0: i32, %arg1: i32, %arg2: memref<1x64x48xbf16, #tpu.memory_space<vmem>>, %arg3: memref<1x48x16xbf16, #tpu.memory_space<vmem>>, %arg4: memref<1x16x33xbf16, #tpu.memory_space<vmem>>, %arg5: memref<1x1x16xbf16, #tpu.memory_space<vmem>>, %arg6: memref<1x1x32xf32, #tpu.memory_space<vmem>>, %arg7: memref<64x16xbf16, #tpu.memory_space<vmem>>, %arg8: memref<32x32xbf16, #tpu.memory_space<vmem>>, %arg9: memref<16x32xbf16, #tpu.memory_space<vmem>>, %arg10: memref<4x32xf32, #tpu.memory_space<vmem>>, %arg11: memref<64x32xf32, #tpu.memory_space<vmem>>, %arg12: memref<64x32xf32, #tpu.memory_space<vmem>>, %arg13: memref<1x1xf32, #tpu.memory_space<vmem>>, %arg14: memref<1x1xf32, #tpu.memory_space<vmem>>) attributes {dimension_semantics = [#tpu.dimension_semantics<parallel>, #tpu.dimension_semantics<arbitrary>], iteration_bounds = array<i64: 1, 2>, scalar_prefetch = 0 : i64, scratch_operands = 3 : i64, tpu.core_type = #tpu.core_type<tc>, window_params = [{transform_indices = @transform_0, window_bounds = array<i64: 1, 64, 48>}, {transform_indices = @transform_1, window_bounds = array<i64: 1, 48, 16>}, {transform_indices = @transform_2, window_bounds = array<i64: 1, 16, 33>}, {transform_indices = @transform_3, window_bounds = array<i64: 1, 1, 16>}, {transform_indices = @transform_4, window_bounds = array<i64: 1, 1, 32>}, {transform_indices = @transform_5, window_bounds = array<i64: 64, 16>}, {pipeline_mode = #tpu.pipeline_mode<synchronous>, transform_indices = @transform_6, window_bounds = array<i64: 32, 32>}, {pipeline_mode = #tpu.pipeline_mode<synchronous>, transform_indices = @transform_7, window_bounds = array<i64: 16, 32>}, {pipeline_mode = #tpu.pipeline_mode<synchronous>, transform_indices = @transform_8, window_bounds = array<i64: 4, 32>}, {transform_indices = @transform_9, window_bounds = array<i64: 64, 32>}]} {
    %c0 = arith.constant 0 : index
    %c0_0 = arith.constant 0 : index
    %c0_1 = arith.constant 0 : index
    %0 = vector.load %arg2[%c0, %c0_0, %c0_1] : memref<1x64x48xbf16, #tpu.memory_space<vmem>>, vector<1x64x48xbf16>
    %1 = vector.shape_cast %0 : vector<1x64x48xbf16> to vector<64x48xbf16>
    %c0_2 = arith.constant 0 : index
    %c0_3 = arith.constant 0 : index
    %c0_4 = arith.constant 0 : index
    %2 = vector.load %arg3[%c0_2, %c0_3, %c0_4] : memref<1x48x16xbf16, #tpu.memory_space<vmem>>, vector<1x48x16xbf16>
    %3 = vector.shape_cast %2 : vector<1x48x16xbf16> to vector<48x16xbf16>
    %c0_5 = arith.constant 0 : index
    %c0_6 = arith.constant 0 : index
    %c0_7 = arith.constant 0 : index
    %4 = vector.load %arg4[%c0_5, %c0_6, %c0_7] : memref<1x16x33xbf16, #tpu.memory_space<vmem>>, vector<1x16x33xbf16>
    %5 = vector.shape_cast %4 : vector<1x16x33xbf16> to vector<16x33xbf16>
    %cst = arith.constant dense<0.000000e+00> : vector<48x33xf32>
    %6 = tpu.matmul %3, %5, %cst {dimension_numbers = #tpu.dot_dimension_numbers<[1], [0], [0], [1], [0, 0, 1, 1], [], []>} : vector<48x16xbf16>, vector<16x33xbf16>, vector<48x33xf32> -> vector<48x33xf32>
    %c0_8 = arith.constant 0 : index
    %c0_9 = arith.constant 0 : index
    %7 = vector.load %arg7[%c0_8, %c0_9] : memref<64x16xbf16, #tpu.memory_space<vmem>>, vector<64x16xbf16>
    %cst_10 = arith.constant dense<0.000000e+00> : vector<64x33xf32>
    %8 = tpu.matmul %7, %5, %cst_10 {dimension_numbers = #tpu.dot_dimension_numbers<[1], [0], [0], [1], [0, 0, 1, 1], [], []>} : vector<64x16xbf16>, vector<16x33xbf16>, vector<64x33xf32> -> vector<64x33xf32>
    %9 = vector.extract_strided_slice %6 {offsets = [0, 0], sizes = [48, 32], strides = [1, 1]} : vector<48x33xf32> to vector<48x32xf32>
    %10 = vector.extract_strided_slice %8 {offsets = [0, 32], sizes = [64, 1], strides = [1, 1]} : vector<64x33xf32> to vector<64x1xf32>
    %c0_11 = arith.constant 0 : index
    %c0_12 = arith.constant 0 : index
    %c0_13 = arith.constant 0 : index
    %11 = vector.load %arg5[%c0_11, %c0_12, %c0_13] : memref<1x1x16xbf16, #tpu.memory_space<vmem>>, vector<1x1x16xbf16>
    %12 = vector.shape_cast %11 : vector<1x1x16xbf16> to vector<1x16xbf16>
    %cst_14 = arith.constant dense<0.000000e+00> : vector<1x48xf32>
    %13 = tpu.matmul %12, %3, %cst_14 {dimension_numbers = #tpu.dot_dimension_numbers<[1], [1], [0], [0], [0, 0, 1, 0], [], []>} : vector<1x16xbf16>, vector<48x16xbf16>, vector<1x48xf32> -> vector<1x48xf32>
    %14 = vector.broadcast %10 : vector<64x1xf32> to vector<64x48xf32>
    %15 = vector.broadcast %13 : vector<1x48xf32> to vector<64x48xf32>
    %16 = arith.addf %14, %15 : vector<64x48xf32>
    %cst_15 = arith.constant 0.000000e+00 : f32
    %17 = vector.broadcast %cst_15 : f32 to vector<64x48xf32>
    %18 = arith.cmpf ogt, %16, %17 : vector<64x48xf32>
    %cst_16 = arith.constant 2.000000e-01 : f32
    %19 = vector.broadcast %cst_16 : f32 to vector<64x48xf32>
    %20 = arith.mulf %19, %16 : vector<64x48xf32>
    %21 = arith.select %18, %16, %20 : vector<64x48xi1>, vector<64x48xf32>
    %cst_17 = arith.constant 0.000000e+00 : bf16
    %22 = vector.broadcast %cst_17 : bf16 to vector<64x48xbf16>
    %23 = arith.cmpf ogt, %1, %22 : vector<64x48xbf16>
    %cst_18 = arith.constant -1.000000e+30 : f32
    %24 = vector.broadcast %cst_18 : f32 to vector<64x48xf32>
    %25 = arith.select %23, %21, %24 : vector<64x48xi1>, vector<64x48xf32>
    %cst_19 = arith.constant dense<0xFF800000> : vector<64xf32>
    %26 = vector.multi_reduction <maximumf>, %25, %cst_19 [1] : vector<64x48xf32> to vector<64xf32>
    %27 = vector.shape_cast %26 : vector<64xf32> to vector<64x1xf32>
    %28 = vector.broadcast %27 : vector<64x1xf32> to vector<64x48xf32>
    %29 = arith.subf %25, %28 : vector<64x48xf32>
    %30 = math.exp %29 : vector<64x48xf32>
    %31 = arith.extf %1 : vector<64x48xbf16> to vector<64x48xf32>
    %32 = arith.mulf %31, %30 : vector<64x48xf32>
    %cst_20 = arith.constant dense<0.000000e+00> : vector<64xf32>
    %33 = vector.multi_reduction <add>, %32, %cst_20 [1] : vector<64x48xf32> to vector<64xf32>
    %34 = vector.shape_cast %33 : vector<64xf32> to vector<64x1xf32>
    %cst_21 = arith.constant 9.99999968E-21 : f32
    %35 = vector.broadcast %cst_21 : f32 to vector<64x1xf32>
    %36 = arith.maximumf %34, %35 : vector<64x1xf32>
    %37 = vector.broadcast %36 : vector<64x1xf32> to vector<64x48xf32>
    %38 = arith.divf %32, %37 : vector<64x48xf32>
    %39 = arith.truncf %38 : vector<64x48xf32> to vector<64x48xbf16>
    %40 = arith.truncf %9 : vector<48x32xf32> to vector<48x32xbf16>
    %cst_22 = arith.constant dense<0.000000e+00> : vector<64x32xf32>
    %41 = tpu.matmul %39, %40, %cst_22 {dimension_numbers = #tpu.dot_dimension_numbers<[1], [0], [0], [1], [0, 0, 1, 1], [], []>} : vector<64x48xbf16>, vector<48x32xbf16>, vector<64x32xf32> -> vector<64x32xf32>
    %c0_23 = arith.constant 0 : index
    %c0_24 = arith.constant 0 : index
    %c0_25 = arith.constant 0 : index
    %42 = vector.load %arg6[%c0_23, %c0_24, %c0_25] : memref<1x1x32xf32, #tpu.memory_space<vmem>>, vector<1x1x32xf32>
    %43 = vector.shape_cast %42 : vector<1x1x32xf32> to vector<1x32xf32>
    %44 = vector.broadcast %43 : vector<1x32xf32> to vector<64x32xf32>
    %45 = arith.addf %41, %44 : vector<64x32xf32>
    %c0_26 = arith.constant 0 : index
    %c0_27 = arith.constant 0 : index
    %46 = vector.load %arg8[%c0_26, %c0_27] : memref<32x32xbf16, #tpu.memory_space<vmem>>, vector<32x32xbf16>
    %47 = arith.truncf %45 : vector<64x32xf32> to vector<64x32xbf16>
    %cst_28 = arith.constant dense<0.000000e+00> : vector<64x32xf32>
    %48 = tpu.matmul %47, %46, %cst_28 {dimension_numbers = #tpu.dot_dimension_numbers<[1], [0], [0], [1], [0, 0, 1, 1], [], []>} : vector<64x32xbf16>, vector<32x32xbf16>, vector<64x32xf32> -> vector<64x32xf32>
    %c0_29 = arith.constant 0 : index
    %c0_30 = arith.constant 0 : index
    %49 = vector.load %arg10[%c0_29, %c0_30] : memref<4x32xf32, #tpu.memory_space<vmem>>, vector<1x32xf32>
    %50 = vector.broadcast %49 : vector<1x32xf32> to vector<64x32xf32>
    %51 = arith.addf %48, %50 : vector<64x32xf32>
    %cst_31 = arith.constant 0.000000e+00 : f32
    %52 = vector.broadcast %cst_31 : f32 to vector<64x32xf32>
    %53 = arith.cmpf ogt, %51, %52 : vector<64x32xf32>
    %cst_32 = arith.constant 2.000000e-01 : f32
    %54 = vector.broadcast %cst_32 : f32 to vector<64x32xf32>
    %55 = arith.mulf %54, %51 : vector<64x32xf32>
    %56 = arith.select %53, %51, %55 : vector<64x32xi1>, vector<64x32xf32>
    %c1 = arith.constant 1 : index
    %c0_33 = arith.constant 0 : index
    %57 = vector.load %arg10[%c1, %c0_33] : memref<4x32xf32, #tpu.memory_space<vmem>>, vector<1x32xf32>
    %58 = vector.broadcast %57 : vector<1x32xf32> to vector<64x32xf32>
    %59 = arith.mulf %56, %58 : vector<64x32xf32>
    %cst_34 = arith.constant dense<0.000000e+00> : vector<64xf32>
    %60 = vector.multi_reduction <add>, %59, %cst_34 [1] : vector<64x32xf32> to vector<64xf32>
    %61 = vector.shape_cast %60 : vector<64xf32> to vector<64x1xf32>
    %cst_35 = arith.constant dense<0.000000e+00> : vector<1xf32>
    %62 = vector.multi_reduction <add>, %61, %cst_35 [0] : vector<64x1xf32> to vector<1xf32>
    %63 = vector.shape_cast %62 : vector<1xf32> to vector<1x1xf32>
    %cst_36 = arith.constant 1.562500e-02 : f32
    %64 = vector.broadcast %cst_36 : f32 to vector<1x1xf32>
    %65 = arith.mulf %63, %64 : vector<1x1xf32>
    %c0_i32 = arith.constant 0 : i32
    %66 = arith.cmpi eq, %arg1, %c0_i32 : i32
    %67 = arith.extui %66 : i1 to i32
    %c0_i32_37 = arith.constant 0 : i32
    %68 = arith.cmpi ne, %67, %c0_i32_37 : i32
    scf.if %68 {
      %c0_41 = arith.constant 0 : index
      %c0_42 = arith.constant 0 : index
      %75 = vector.load %arg13[%c0_41, %c0_42] : memref<1x1xf32, #tpu.memory_space<vmem>>, vector<1x1xf32>
      tpu.vector_store %arg13[%c0_41, %c0_42], %65 {strides = array<i32>} : memref<1x1xf32, #tpu.memory_space<vmem>>, vector<1x1xf32>,
      %cst_43 = arith.constant 1.000000e+00 : f32
      %76 = vector.broadcast %cst_43 : f32 to vector<1x1xf32>
      %c0_44 = arith.constant 0 : index
      %c0_45 = arith.constant 0 : index
      %77 = vector.load %arg14[%c0_44, %c0_45] : memref<1x1xf32, #tpu.memory_space<vmem>>, vector<1x1xf32>
      tpu.vector_store %arg14[%c0_44, %c0_45], %76 {strides = array<i32>} : memref<1x1xf32, #tpu.memory_space<vmem>>, vector<1x1xf32>,
      %c0_46 = arith.constant 0 : index
      %c0_47 = arith.constant 0 : index
      %78 = vector.load %arg12[%c0_46, %c0_47] : memref<64x32xf32, #tpu.memory_space<vmem>>, vector<64x32xf32>
      tpu.vector_store %arg12[%c0_46, %c0_47], %45 {strides = array<i32>} : memref<64x32xf32, #tpu.memory_space<vmem>>, vector<64x32xf32>,
    } else {
    }
    %c0_i32_38 = arith.constant 0 : i32
    %69 = arith.cmpi sgt, %arg1, %c0_i32_38 : i32
    %70 = arith.extui %69 : i1 to i32
    %c0_i32_39 = arith.constant 0 : i32
    %71 = arith.cmpi ne, %70, %c0_i32_39 : i32
    scf.if %71 {
      %c0_41 = arith.constant 0 : index
      %c0_42 = arith.constant 0 : index
      %75 = vector.load %arg13[%c0_41, %c0_42] : memref<1x1xf32, #tpu.memory_space<vmem>>, vector<1x1xf32>
      %76 = arith.maximumf %75, %65 : vector<1x1xf32>
      %77 = arith.subf %75, %76 : vector<1x1xf32>
      %78 = math.exp %77 : vector<1x1xf32>
      %79 = arith.subf %65, %76 : vector<1x1xf32>
      %80 = math.exp %79 : vector<1x1xf32>
      %c0_43 = arith.constant 0 : index
      %c0_44 = arith.constant 0 : index
      %81 = vector.load %arg14[%c0_43, %c0_44] : memref<1x1xf32, #tpu.memory_space<vmem>>, vector<1x1xf32>
      %82 = arith.mulf %81, %78 : vector<1x1xf32>
      %83 = arith.addf %82, %80 : vector<1x1xf32>
      %c0_45 = arith.constant 0 : index
      %c0_46 = arith.constant 0 : index
      %84 = vector.load %arg14[%c0_45, %c0_46] : memref<1x1xf32, #tpu.memory_space<vmem>>, vector<1x1xf32>
      tpu.vector_store %arg14[%c0_45, %c0_46], %83 {strides = array<i32>} : memref<1x1xf32, #tpu.memory_space<vmem>>, vector<1x1xf32>,
      %c0_47 = arith.constant 0 : index
      %c0_48 = arith.constant 0 : index
      %85 = vector.load %arg12[%c0_47, %c0_48] : memref<64x32xf32, #tpu.memory_space<vmem>>, vector<64x32xf32>
      %86 = vector.broadcast %78 : vector<1x1xf32> to vector<64x32xf32>
      %87 = arith.mulf %85, %86 : vector<64x32xf32>
      %88 = vector.broadcast %80 : vector<1x1xf32> to vector<64x32xf32>
      %89 = arith.mulf %88, %45 : vector<64x32xf32>
      %90 = arith.addf %87, %89 : vector<64x32xf32>
      %c0_49 = arith.constant 0 : index
      %c0_50 = arith.constant 0 : index
      %91 = vector.load %arg12[%c0_49, %c0_50] : memref<64x32xf32, #tpu.memory_space<vmem>>, vector<64x32xf32>
      tpu.vector_store %arg12[%c0_49, %c0_50], %90 {strides = array<i32>} : memref<64x32xf32, #tpu.memory_space<vmem>>, vector<64x32xf32>,
      %c0_51 = arith.constant 0 : index
      %c0_52 = arith.constant 0 : index
      %92 = vector.load %arg13[%c0_51, %c0_52] : memref<1x1xf32, #tpu.memory_space<vmem>>, vector<1x1xf32>
      tpu.vector_store %arg13[%c0_51, %c0_52], %76 {strides = array<i32>} : memref<1x1xf32, #tpu.memory_space<vmem>>, vector<1x1xf32>,
    } else {
    }
    %c1_i32 = arith.constant 1 : i32
    %72 = arith.cmpi eq, %arg1, %c1_i32 : i32
    %73 = arith.extui %72 : i1 to i32
    %c0_i32_40 = arith.constant 0 : i32
    %74 = arith.cmpi ne, %73, %c0_i32_40 : i32
    scf.if %74 {
      %c0_41 = arith.constant 0 : index
      %c0_42 = arith.constant 0 : index
      %75 = vector.load %arg12[%c0_41, %c0_42] : memref<64x32xf32, #tpu.memory_space<vmem>>, vector<64x32xf32>
      %c0_43 = arith.constant 0 : index
      %c0_44 = arith.constant 0 : index
      %76 = vector.load %arg14[%c0_43, %c0_44] : memref<1x1xf32, #tpu.memory_space<vmem>>, vector<1x1xf32>
      %77 = vector.broadcast %76 : vector<1x1xf32> to vector<64x32xf32>
      %78 = arith.divf %75, %77 : vector<64x32xf32>
      %c0_45 = arith.constant 0 : index
      %c0_46 = arith.constant 0 : index
      %79 = vector.load %arg7[%c0_45, %c0_46] : memref<64x16xbf16, #tpu.memory_space<vmem>>, vector<64x16xbf16>
      %c0_47 = arith.constant 0 : index
      %c0_48 = arith.constant 0 : index
      %80 = vector.load %arg9[%c0_47, %c0_48] : memref<16x32xbf16, #tpu.memory_space<vmem>>, vector<16x32xbf16>
      %cst_49 = arith.constant dense<0.000000e+00> : vector<64x32xf32>
      %81 = tpu.matmul %79, %80, %cst_49 {dimension_numbers = #tpu.dot_dimension_numbers<[1], [0], [0], [1], [0, 0, 1, 1], [], []>} : vector<64x16xbf16>, vector<16x32xbf16>, vector<64x32xf32> -> vector<64x32xf32>
      %c2 = arith.constant 2 : index
      %c0_50 = arith.constant 0 : index
      %82 = vector.load %arg10[%c2, %c0_50] : memref<4x32xf32, #tpu.memory_space<vmem>>, vector<1x32xf32>
      %83 = vector.broadcast %82 : vector<1x32xf32> to vector<64x32xf32>
      %84 = arith.addf %81, %83 : vector<64x32xf32>
      %c3 = arith.constant 3 : index
      %c0_51 = arith.constant 0 : index
      %85 = vector.load %arg10[%c3, %c0_51] : memref<4x32xf32, #tpu.memory_space<vmem>>, vector<1x32xf32>
      %86 = vector.broadcast %85 : vector<1x32xf32> to vector<64x32xf32>
      %87 = arith.mulf %86, %78 : vector<64x32xf32>
      %cst_52 = arith.constant 1.000000e+00 : f32
      %88 = vector.broadcast %cst_52 : f32 to vector<1x32xf32>
      %89 = arith.subf %88, %85 : vector<1x32xf32>
      %90 = vector.broadcast %89 : vector<1x32xf32> to vector<64x32xf32>
      %91 = arith.mulf %90, %84 : vector<64x32xf32>
      %92 = arith.addf %87, %91 : vector<64x32xf32>
      %c0_53 = arith.constant 0 : index
      %c0_54 = arith.constant 0 : index
      %93 = vector.load %arg11[%c0_53, %c0_54] : memref<64x32xf32, #tpu.memory_space<vmem>>, vector<64x32xf32>
      tpu.vector_store %arg11[%c0_53, %c0_54], %92 {strides = array<i32>} : memref<64x32xf32, #tpu.memory_space<vmem>>, vector<64x32xf32>,
    } else {
    }
    return
  }
  func.func @transform_0(%arg0: i32, %arg1: i32) -> (i32, i32, i32) {
    %c0_i32 = arith.constant 0 : i32
    %c0_i32_0 = arith.constant 0 : i32
    return %arg1, %arg0, %c0_i32 : i32, i32, i32
  }
  func.func @transform_1(%arg0: i32, %arg1: i32) -> (i32, i32, i32) {
    %c0_i32 = arith.constant 0 : i32
    %c0_i32_0 = arith.constant 0 : i32
    %c0_i32_1 = arith.constant 0 : i32
    return %arg1, %c0_i32, %c0_i32_0 : i32, i32, i32
  }
  func.func @transform_2(%arg0: i32, %arg1: i32) -> (i32, i32, i32) {
    %c0_i32 = arith.constant 0 : i32
    %c0_i32_0 = arith.constant 0 : i32
    %c0_i32_1 = arith.constant 0 : i32
    return %arg1, %c0_i32, %c0_i32_0 : i32, i32, i32
  }
  func.func @transform_3(%arg0: i32, %arg1: i32) -> (i32, i32, i32) {
    %c0_i32 = arith.constant 0 : i32
    %c0_i32_0 = arith.constant 0 : i32
    %c0_i32_1 = arith.constant 0 : i32
    return %arg1, %c0_i32, %c0_i32_0 : i32, i32, i32
  }
  func.func @transform_4(%arg0: i32, %arg1: i32) -> (i32, i32, i32) {
    %c0_i32 = arith.constant 0 : i32
    %c0_i32_0 = arith.constant 0 : i32
    %c0_i32_1 = arith.constant 0 : i32
    return %arg1, %c0_i32, %c0_i32_0 : i32, i32, i32
  }
  func.func @transform_5(%arg0: i32, %arg1: i32) -> (i32, i32) {
    %c0_i32 = arith.constant 0 : i32
    %c0_i32_0 = arith.constant 0 : i32
    return %arg0, %c0_i32 : i32, i32
  }
  func.func @transform_6(%arg0: i32, %arg1: i32) -> (i32, i32) {
    %c0_i32 = arith.constant 0 : i32
    %c0_i32_0 = arith.constant 0 : i32
    %c0_i32_1 = arith.constant 0 : i32
    return %c0_i32, %c0_i32_0 : i32, i32
  }
  func.func @transform_7(%arg0: i32, %arg1: i32) -> (i32, i32) {
    %c0_i32 = arith.constant 0 : i32
    %c0_i32_0 = arith.constant 0 : i32
    %c0_i32_1 = arith.constant 0 : i32
    return %c0_i32, %c0_i32_0 : i32, i32
  }
  func.func @transform_8(%arg0: i32, %arg1: i32) -> (i32, i32) {
    %c0_i32 = arith.constant 0 : i32
    %c0_i32_0 = arith.constant 0 : i32
    %c0_i32_1 = arith.constant 0 : i32
    return %c0_i32, %c0_i32_0 : i32, i32
  }
  func.func @transform_9(%arg0: i32, %arg1: i32) -> (i32, i32) {
    %c0_i32 = arith.constant 0 : i32
    %c0_i32_0 = arith.constant 0 : i32
    return %arg0, %c0_i32 : i32, i32
  }
}

</mosaic_0001>

<bundles_post_ra>
// kernel: tpu_custom_call.1
= control target key start
LH: loop header
LB: loop body
LE: loop exit
PB: predicated region body
PF: predicated region fallthrough
CT: control target
= control target key end

     0   :  { %s1949_s30 = smov 0   ;;  %s1951_s10 = smov 0   ;;  %s2286_s0 = inlined_call_operand.vmem [shape: bf16[2,64,48], index: 0, kind: input, shape index: {}]   ;;  %s2287_s1 = inlined_call_operand.vmem [shape: bf16[2,48,16], index: 1, kind: input, shape index: {}]   ;;  %s2288_s2 = inlined_call_operand.vmem [shape: bf16[2,16,33], index: 2, kind: input, shape index: {}]   ;;  %s2289_s3 = inlined_call_operand.vmem [shape: bf16[2,1,16], index: 3, kind: input, shape index: {}]   ;;  %s2290_s4 = inlined_call_operand.vmem [shape: f32[2,1,32], index: 4, kind: input, shape index: {}]   ;;  %s2291_s5 = inlined_call_operand.vmem [shape: bf16[64,16], index: 5, kind: input, shape index: {}]   ;;  %s2292_s6 = inlined_call_operand.vmem [shape: bf16[32,32], index: 6, kind: input, shape index: {}]   ;;  %s2293_s7 = inlined_call_operand.vmem [shape: bf16[16,32], index: 7, kind: input, shape index: {}]   ;;  %s2294_s8 = inlined_call_operand.vmem [shape: f32[4,32], index: 8, kind: input, shape index: {}]   ;;  %s2295_s9 = inlined_call_operand.vmem [shape: f32[64,32], index: 9, kind: output, shape index: {}]  }
   0x1   :  { %s1953_s11 = smov 0  }
   0x2 LB: > { %s28_s12 = sadd.s32 1, %s1886_s10  ;;  %p1617_p0 = scmp.ge.s32.totalorder %s1890_s11, 1  ;;  %s1890_s11 = sphi %s1953_s11, %s19_s11   ;;  %s1886_s10 = sphi %s1951_s10, %s2307_s10   ;;  %s1882_s30 = sphi %s1949_s30, %s2306_s30  }
   0x3   : > { %p29_p1 = scmp.ge.s32.totalorder %s28_s12, 2  ;;  %p353_p2 = scmp.lt.s32.totalorder %s1890_s11, 3 }
   0x5   : > { %s2309_s12 = smov (%p29_p1, %s28_s12), 0  ;;  %p354_p3 = pnand %p1617_p0, %p353_p2 }
   0x6   : > { %p415_p4 = scmp.lt.s32.totalorder (!%p354_p3), %s1882_s30, 1  ;;  %p1652_p5 = scmp.ne.s32.totalorder (!%p354_p3), %s1882_s30, 0 }
   0x7   : > { %357 = sbr.rel (%p354_p3) target bundleno = 1639 (0x667), region = 56 }
   0xc   : > { %vm492_vm0 = vcmask 130048   ;;  %v1814_v0 = vld [vmem:[%s2291_s5] sm:$0xff]   ;;  %s1974_s15 = scalar_select %p415_p4, %s1882_s30, 1  ;;  %v1892_v1 = vmov 0.0   ;;  %vm1893_vm1 = vmmov 0   ;;  %v1894_v2 = vmov 32  }
   0xd   : > { %1703 = vmatprep.subr.bf16.mxu0 %v1892_v1  ;;  %1719 = vmatprep.mubr.msk.bf16.mxu1 %vm492_vm0, %v1814_v0  ;;  %v1815_v4 = vld [vmem:[%s2291_s5 + $0x8] sm:$0xff]   ;;  %v1816_v6 = vld [vmem:[%s2291_s5 + $0x10] sm:$0xff]   ;;  %v1817_v10 = vld [vmem:[%s2291_s5 + $0x18] sm:$0xff]   ;;  %v748_v41 = vlaneseq  ;;  %v1895_v49 = vmov 0   ;;  %vm824_vm9 = vcmask 392192  }
   0xe   : > { %s1671_s16 = sshll.u32 %s1974_s15, 3  ;;  %1705 = vmatprep.mubr.msk.bf16.mxu0 %vm1893_vm1, %v1892_v1  ;;  %s1779_s17 = smul.u32 24, %s1974_s15  ;;  %1812 = vset.pattern.permute.xlu1 %v1894_v2 }
   0xf   : > { %s433_s20 = scalar_lea.vmem %s2288_s2, %s1671_s16  ;;  %1811 = vset.pattern.permute.xlu0 %v1894_v2  ;;  %s436_s16 = scalar_lea.vmem %s2289_s3, %s1974_s15  ;;  %v749_v42 = vshrl.u32 %v748_v41, 7 }
  0x10   : > { %v1813_v3 = vld [vmem:[%s433_s20] sm:$0xff]   ;;  %s428_s25 = scalar_lea.vmem %s2287_s1, %s1779_s17  ;;  %s1670_s17 = sshll.u32 %s1974_s15, 5 }
  0x11   : > { %v1818_v5 = vld [vmem:[%s428_s25] sm:$0xff]   ;;  %1717 = vmatprep.subr.bf16.mxu1 %v1813_v3  ;;  %1704 = vmatpush3.bf16.msra.mxu0 %v1813_v3  ;;  %v1820_v7 = vld [vmem:[%s428_s25 + $0x10] sm:$0xff]   ;;  %v1819_v9 = vld [vmem:[%s428_s25 + $0x8] sm:$0xff]   ;;  %s2016_s20 = scalar_lea.vmem %s2286_s0, %s1670_s17  ;;  %v2024_v45 = vsub.s32 0, %v749_v42  ;;  %s439_s27 = scalar_lea.vmem %s2290_s4, %s1974_s15 }
  0x12   : > { %1718 = vmatpush3.bf16.msra.mxu1 %v1813_v3  ;;  %1727 = vmatprep.subr.bf16.mxu0 %v1892_v1  ;;  %v500_v8 = vsel %vm492_vm0, %v1820_v7, 0  ;;  %v497_v11 = vsel %vm492_vm0, %v1819_v9, 0  ;;  %v494_v12 = vsel %vm492_vm0, %v1818_v5, 0  ;;  %v664_v13 = vld [vmem:[%s436_s16] sm:$0x1] }
  0x13   : > { %v2019_v43 = vld [vmem:[%s2016_s20] sm:$0xf]  ;;  %v2022_v44 = vld [vmem:[%s2016_s20 + $0x8] sm:$0xf]  ;;  %v2027_v46 = vld [vmem:[%s2016_s20 + $0x4] sm:$0xf] }
  0x14   : > { %1706 = vmatmul.mubr.msk.bf16.vlgmr.msra.gmra.mxu0 %vm492_vm0, %v1818_v5  ;;  %vm784_vm2 = vcmp.gt.bf16.partialorder %v2019_v43, 0  ;;  %vm786_vm3 = vcmp.gt.bf16.partialorder %v2022_v44, 0  ;;  %vm785_vm4 = vcmp.gt.bf16.partialorder %v2027_v46, 0  ;;  %v2033_v47 = vld [vmem:[%s2016_s20 + $0xc] sm:$0xf] }
  0x15   : > { %1720 = vmatmul.mubr.msk.bf16.vlgmr.msra.gmra.mxu1 %vm492_vm0, %v1815_v4  ;;  %1709 = vmatprep.mubr.msk.bf16.mxu0 %vm1893_vm1, %v1892_v1  ;;  %v792_v50 = vsel %vm784_vm2, 65537, %v1895_v49  ;;  %v794_v51 = vsel %vm786_vm3, 65537, %v1895_v49  ;;  %v2039_v52 = vld [vmem:[%s2016_s20 + $0x10] sm:$0xf]  ;;  %v793_v53 = vsel %vm785_vm4, 65537, %v1895_v49  ;;  %vm787_vm5 = vcmp.gt.bf16.partialorder %v2033_v47, 0 }
  0x16   : > { %1723 = vmatprep.mubr.msk.bf16.mxu1 %vm492_vm0, %v1816_v6  ;;  %1728 = vmatpush3.bf16.xpose.msra.mxu0 %v500_v8  ;;  %v800_v55 = vunpack.c.l.b16 %v792_v50  ;;  %v802_v56 = vunpack.c.l.b16 %v794_v51  ;;  %vm788_vm6 = vcmp.gt.bf16.partialorder %v2039_v52, 0  ;;  %v2045_v58 = vld [vmem:[%s2016_s20 + $0x18] sm:$0xf]  ;;  %v801_v60 = vunpack.c.l.b16 %v793_v53  ;;  %v2048_v62 = vld [vmem:[%s2016_s20 + $0x14] sm:$0xf] }
  0x17   : > { %1729 = vmatprep.subr.bf16.mxu0 %v1892_v1  ;;  %v795_v61 = vsel %vm787_vm5, 65537, %v1895_v49  ;;  %vm790_vm11 = vcmp.gt.bf16.partialorder %v2045_v58, 0  ;;  %vm789_vm13 = vcmp.gt.bf16.partialorder %v2048_v62, 0 }
  0x18   : > { %vm2051_vm8 = vcmp.ne.s32.totalorder %v800_v55, 0  ;;  %vm2055_vm10 = vcmp.ne.s32.totalorder %v802_v56, 0  ;;  %vm2065_vm14 = vcmp.ne.s32.totalorder %v801_v60, 0 }
  0x1c   : > { %1710 = vmatmul.mubr.msk.bf16.gmra.mxu0 %vm492_vm0, %v1819_v9 }
  0x1d   : > { %1724 = vmatmul.mubr.msk.bf16.gmra.mxu1 %vm492_vm0, %v1817_v10  ;;  %1713 = vmatprep.mubr.msk.bf16.mxu0 %vm1893_vm1, %v1892_v1 }
  0x1e   : > { %1730 = vmatpush3.bf16.xpose.msra.mxu0 %v497_v11 }
  0x1f   : > { %1731 = vmatprep.subr.bf16.mxu0 %v1892_v1 }
  0x24   : > { %1714 = vmatmul.mubr.msk.bf16.gmra.mxu0 %vm492_vm0, %v1820_v7  ;;  %v2063_v7 = vld [vmem:[%s2016_s20 + $0x1c] sm:$0xf] }
  0x25   : > { %1733 = vmatprep.mubr.msk.bf16.mxu0 %vm1893_vm1, %v1892_v1  ;;  %v796_v1 = vsel %vm788_vm6, 65537, %v1895_v49  ;;  %vm791_vm1 = vcmp.gt.bf16.partialorder %v2063_v7, 0 }
  0x26   : > { %1732 = vmatpush3.bf16.xpose.msra.mxu0 %v494_v12  ;;  %v804_v11 = vunpack.c.l.b16 %v796_v1  ;;  %v803_v12 = vunpack.c.l.b16 %v795_v61 }
  0x28   : > { %vm811_vm3 = vcmp.ne.s32.totalorder %v803_v12, 0  ;;  %vm2077_vm4 = vcmp.ne.s32.totalorder %v804_v11, 0 }
  0x2d   : > { %1734 = vmatmul.mubr.msk.bf16.vlgmr.msra.gmra.mxu0 %vm492_vm0, %v664_v13 }
  0xd4   : > { %v536_v14 = vpop.f32.mrf.mxu0 }
  0xd5   : > { %v1721_v15 = vpop.f32.mrf.mxu1 }
  0xd6   : > { %720 = vperm.xlu1 %1812, %v1721_v15   ;;  %v1707_v16 = vpop.f32.mrf.mxu0 }
  0xd7   : > { %v633_v17 = vpop.f32.mrf.mxu1  ;;  %v798_v16 = vsel %vm790_vm11, 65537, %v1895_v49 }
  0xd8   : > { %710 = vperm.xlu0 %1811, %v633_v17   ;;  %v539_v18 = vpop.f32.mrf.mxu0 }
  0xd9   : > { %v1722_v19 = vpop.f32.mrf.mxu1  ;;  %v941_v36 = vpack.c.bf16 %v539_v18, %v536_v14  ;;  %v797_v18 = vsel %vm789_vm13, 65537, %v1895_v49 }
  0xda   : > { %725 = vperm.xlu1 %1812, %v1722_v19   ;;  %v1708_v20 = vpop.f32.mrf.mxu0 }
  0xdb   : > { %v636_v21 = vpop.f32.mrf.mxu1 }
  0xdc   : > { %715 = vperm.xlu0 %1811, %v636_v21   ;;  %v544_v22 = vpop.f32.mrf.mxu0 }
  0xdd   : > { %v1725_v23 = vpop.f32.mrf.mxu1 }
  0xde   : > { %v1711_v24 = vpop.f32.mrf.mxu0 }
  0xdf   : > { %v649_v25 = vpop.f32.mrf.mxu1 }
  0xe0   : > { %730 = vperm.xlu0 %1811, %v649_v25   ;;  %v547_v26 = vpop.f32.mrf.mxu0 }
  0xe1   : > { %v1726_v27 = vpop.f32.mrf.mxu1  ;;  %v942_v33 = vpack.c.bf16 %v547_v26, %v544_v22 }
  0xe2   : > { %v1712_v28 = vpop.f32.mrf.mxu0 }
  0xe3   : > { %v652_v29 = vpop.f32.mrf.mxu1 }
  0xe4   : > { %740 = vperm.xlu0 %1811, %v1725_v23   ;;  %735 = vperm.xlu1 %1812, %v652_v29   ;;  %v552_v30 = vpop.f32.mrf.mxu0 }
  0xe6   : > { %v1715_v31 = vpop.f32.mrf.mxu0 }
  0xe7   : > { %v799_v31 = vsel %vm791_vm1, 65537, %v1895_v49 }
  0xe8   : > { %745 = vperm.xlu1 %1812, %v1726_v27   ;;  %v555_v32 = vpop.f32.mrf.mxu0  ;;  %v806_v27 = vunpack.c.l.b16 %v798_v16  ;;  %v807_v49 = vunpack.c.l.b16 %v799_v31  ;;  %v874_v31 = vunpack.c.l.bf16 %v2027_v46 }
  0xe9   : > { %v943_v34 = vpack.c.bf16 %v555_v32, %v552_v30  ;;  %v805_v30 = vunpack.c.l.b16 %v797_v18 }
  0xea   : > { %v1716_v35 = vpop.f32.mrf.mxu0  ;;  %vm2089_vm6 = vcmp.ne.s32.totalorder %v806_v27, 0  ;;  %vm815_vm11 = vcmp.ne.s32.totalorder %v807_v49, 0 }
  0xeb   : > { %1737 = vmatprep.subr.bf16.mxu1 %v943_v34 }
  0xec   : > { %1738 = vmatpush3.bf16.msra.mxu1 %v943_v34 }
  0xed   : > { %1739 = vmatprep.subr.bf16.mxu1 %v942_v33  ;;  %v702_v37 = vpop.f32.mrf.mxu0 }
  0xee   : > { %v2036_v48 = vrot.slane %v702_v37, %v2024_v45 }
  0xef   : > { %v1735_v38 = vpop.f32.mrf.mxu0 }
  0xf0   : > { %1740 = vmatpush3.bf16.msra.mxu1 %v942_v33 }
  0xf1   : > { %1741 = vmatprep.subr.bf16.mxu1 %v941_v36  ;;  %v705_v39 = vpop.f32.mrf.mxu0 }
  0xf3   : > { %v1736_v40 = vpop.f32.mrf.mxu0 }
  0xf4   : > { %1742 = vmatpush3.bf16.msra.mxu1 %v941_v36 }
 0x151   : > { %v721_v54 = vpop.permute.xlu1 %720 }
 0x152   : > { %v754_v57 = vadd.f32 %v2036_v48, %v721_v54 }
 0x153   : > { %v711_v59 = vpop.permute.xlu0 %710 }
 0x154   : > { %v770_v63 = vmul.f32 0.2, %v754_v57  ;;  %v752_v0 = vadd.f32 %v2036_v48, %v711_v59  ;;  %vm762_vm7 = vcmp.gt.f32.partialorder %v754_v57, 0.0 }
 0x155   : > { %v726_v2 = vpop.permute.xlu1 %725 }
 0x156   : > { %v768_v5 = vmul.f32 0.2, %v752_v0  ;;  %v755_v6 = vadd.f32 %v2036_v48, %v726_v2  ;;  %vm760_vm12 = vcmp.gt.f32.partialorder %v752_v0, 0.0  ;;  %v778_v10 = vsel %vm762_vm7, %v754_v57, %v770_v63 }
 0x157   : > { %v716_v8 = vpop.permute.xlu0 %715  ;;  %v818_v21 = vsel %vm2055_vm10, %v778_v10, -1e+30  ;;  %vm813_vm7 = vcmp.ne.s32.totalorder %v805_v30, 0 }
 0x158   : > { %v771_v13 = vmul.f32 0.2, %v755_v6  ;;  %v753_v14 = vadd.f32 %v2036_v48, %v716_v8  ;;  %v776_v15 = vsel %vm760_vm12, %v752_v0, %v768_v5  ;;  %vm763_vm15 = vcmp.gt.f32.partialorder %v755_v6, 0.0 }
 0x159   : > { %v816_v17 = vsel %vm2051_vm8, %v776_v15, -1e+30  ;;  %v831_v29 = vsel %vm824_vm9, %v818_v21, -inf }
 0x15a   : > { %v769_v19 = vmul.f32 0.2, %v753_v14  ;;  %v825_v20 = vsel %vm824_vm9, %v816_v17, -inf  ;;  %vm761_vm2 = vcmp.gt.f32.partialorder %v753_v14, 0.0  ;;  %v779_v23 = vsel %vm763_vm15, %v755_v6, %v771_v13 }
 0x15b   : > { %v731_v22 = vpop.permute.xlu0 %730  ;;  %826 = vmax.xlane.f32.xlu0 %v825_v20  ;;  %v819_v34 = vsel %vm811_vm3, %v779_v23, -1e+30 }
 0x15c   : > { %v756_v24 = vadd.f32 %v2036_v48, %v731_v22  ;;  %v777_v25 = vsel %vm761_vm2, %v753_v14, %v769_v19  ;;  %v834_v42 = vsel %vm824_vm9, %v819_v34, -inf }
 0x15d   : > { %v817_v28 = vsel %vm2065_vm14, %v777_v25, -1e+30 }
 0x15e   : > { %v772_v32 = vmul.f32 0.2, %v756_v24  ;;  %v828_v33 = vsel %vm824_vm9, %v817_v28, -inf  ;;  %vm764_vm5 = vcmp.gt.f32.partialorder %v756_v24, 0.0 }
 0x15f   : > { %v741_v35 = vpop.permute.xlu0 %740  ;;  %v736_v36 = vpop.permute.xlu1 %735  ;;  %829 = vmax.xlane.f32.xlu1 %v828_v33  ;;  %832 = vmax.xlane.f32.xlu0 %v831_v29 }
 0x160   : > { %v758_v37 = vadd.f32 %v2036_v48, %v741_v35  ;;  %v757_v38 = vadd.f32 %v2036_v48, %v736_v36  ;;  %v780_v39 = vsel %vm764_vm5, %v756_v24, %v772_v32  ;;  %v875_v32 = vunpack.c.l.bf16 %v2022_v44 }
 0x161   : > { %v820_v41 = vsel %vm2077_vm4, %v780_v39, -1e+30  ;;  %v877_v36 = vunpack.c.l.bf16 %v2039_v52 }
 0x162   : > { %v774_v50 = vmul.f32 0.2, %v758_v37  ;;  %v773_v51 = vmul.f32 0.2, %v757_v38  ;;  %v837_v53 = vsel %vm824_vm9, %v820_v41, -inf  ;;  %vm766_vm8 = vcmp.gt.f32.partialorder %v758_v37, 0.0 }
 0x163   : > { %v746_v54 = vpop.permute.xlu1 %745  ;;  %838 = vmax.xlane.f32.xlu1 %v837_v53  ;;  %835 = vmax.xlane.f32.xlu0 %v834_v42  ;;  %vm765_vm10 = vcmp.gt.f32.partialorder %v757_v38, 0.0  ;;  %v879_v42 = vunpack.c.l.bf16 %v2045_v58 }
 0x164   : > { %v759_v55 = vadd.f32 %v2036_v48, %v746_v54  ;;  %v782_v56 = vsel %vm766_vm8, %v758_v37, %v774_v50  ;;  %v781_v57 = vsel %vm765_vm10, %v757_v38, %v773_v51  ;;  %v876_v38 = vunpack.c.l.bf16 %v2033_v47 }
 0x165   : > { %v822_v59 = vsel %vm2089_vm6, %v782_v56, -1e+30  ;;  %v821_v60 = vsel %vm813_vm7, %v781_v57, -1e+30  ;;  %v878_v50 = vunpack.c.l.bf16 %v2048_v62 }
 0x166   : > { %v775_v61 = vmul.f32 0.2, %v759_v55  ;;  %v843_v63 = vsel %vm824_vm9, %v822_v59, -inf  ;;  %v840_v0 = vsel %vm824_vm9, %v821_v60, -inf  ;;  %vm767_vm12 = vcmp.gt.f32.partialorder %v759_v55, 0.0 }
 0x167   : > { %844 = vmax.xlane.f32.xlu1 %v843_v63  ;;  %841 = vmax.xlane.f32.xlu0 %v840_v0 }
 0x168   : > { %v783_v1 = vsel %vm767_vm12, %v759_v55, %v775_v61  ;;  %v880_v55 = vunpack.c.l.bf16 %v2063_v7 }
 0x169   : > { %v823_v2 = vsel %vm815_vm11, %v783_v1, -1e+30 }
 0x16a   : > { %v846_v3 = vsel %vm824_vm9, %v823_v2, -inf }
 0x16b   : > { %847 = vmax.xlane.f32.xlu0 %v846_v3 }
 0x1e4   : > { %v827_v48 = vpop.xlane.xlu0 %826 }
 0x1e5   : > { %v849_v4 = vsub.f32 %v816_v17, %v827_v48 }
 0x1e7   : > { %v857_v5 = vmul.f32 1.442695, %v849_v4 }
 0x1e8   : > { %v830_v6 = vpop.xlane.xlu1 %829  ;;  %v833_v8 = vpop.xlane.xlu0 %832 }
 0x1e9   : > { %1823 = vpow2.f32 %v857_v5  ;;  %v850_v9 = vsub.f32 %v817_v28, %v830_v6  ;;  %v851_v10 = vsub.f32 %v818_v21, %v833_v8  ;;  %v873_v21 = vunpack.c.l.bf16 %v2019_v43 }
 0x1eb   : > { %v859_v11 = vmul.f32 1.442695, %v850_v9  ;;  %v861_v12 = vmul.f32 1.442695, %v851_v10 }
 0x1ec   : > { %v839_v13 = vpop.xlane.xlu1 %838  ;;  %v836_v14 = vpop.xlane.xlu0 %835 }
 0x1ed   : > { %1825 = vpow2.f32 %v859_v11  ;;  %v853_v15 = vsub.f32 %v820_v41, %v839_v13  ;;  %v852_v16 = vsub.f32 %v819_v34, %v836_v14 }
 0x1ee   : > { %1827 = vpow2.f32 %v861_v12 }
 0x1ef   : > { %v865_v18 = vmul.f32 1.442695, %v853_v15  ;;  %v863_v19 = vmul.f32 1.442695, %v852_v16 }
 0x1f0   : > { %v845_v20 = vpop.xlane.xlu1 %844  ;;  %v842_v22 = vpop.xlane.xlu0 %841 }
 0x1f1   : > { %1829 = vpow2.f32 %v865_v18  ;;  %v855_v17 = vsub.f32 %v822_v59, %v845_v20  ;;  %v854_v23 = vsub.f32 %v821_v60, %v842_v22 }
 0x1f2   : > { %1831 = vpow2.f32 %v863_v19 }
 0x1f3   : > { %v869_v24 = vmul.f32 1.442695, %v855_v17  ;;  %v867_v25 = vmul.f32 1.442695, %v854_v23 }
 0x1f4   : > { %v848_v26 = vpop.xlane.xlu0 %847 }
 0x1f5   : > { %1833 = vpow2.f32 %v869_v24  ;;  %v856_v27 = vsub.f32 %v823_v2, %v848_v26 }
 0x1f6   : > { %v1824_v28 = vpop.eup %1823  ;;  %1835 = vpow2.f32 %v867_v25 }
 0x1f7   : > { %v871_v29 = vmul.f32 1.442695, %v856_v27  ;;  %v2104_v30 = vmul.f32 %v1824_v28, %v873_v21 }
 0x1f9   : > { %1837 = vpow2.f32 %v871_v29  ;;  %v889_v33 = vsel %vm824_vm9, %v2104_v30, 0.0 }
 0x1fa   : > { %v1826_v34 = vpop.eup %1825  ;;  %890 = vadd.xlane.f32.xlu1 %v889_v33  ;;  %v1821_v33 = vld [vmem:[%s2292_s6 + $0x8] sm:$0xff]  }
 0x1fb   : > { %v1828_v35 = vpop.eup %1827  ;;  %v882_v43 = vmul.f32 %v1826_v34, %v874_v31  ;;  %1751 = vmatprep.subr.bf16.mxu0 %v1821_v33  ;;  %1773 = vmatprep.subr.bf16.mxu1 %v1821_v33  ;;  %v1822_v34 = vld [vmem:[%s2292_s6] sm:$0xff]  }
 0x1fc   : > { %v883_v37 = vmul.f32 %v1828_v35, %v875_v32  ;;  %1752 = vmatpush3.bf16.msra.mxu0 %v1821_v33 }
 0x1fd   : > { %v892_v39 = vsel %vm824_vm9, %v882_v43, 0.0  ;;  %1753 = vmatprep.subr.bf16.mxu0 %v1822_v34 }
 0x1fe   : > { %v1830_v40 = vpop.eup %1829  ;;  %893 = vadd.xlane.f32.xlu0 %v892_v39  ;;  %v895_v46 = vsel %vm824_vm9, %v883_v37, 0.0 }
 0x1ff   : > { %v1832_v44 = vpop.eup %1831  ;;  %896 = vadd.xlane.f32.xlu1 %v895_v46  ;;  %v885_v41 = vmul.f32 %v1830_v40, %v877_v36 }
 0x200   : > { %v884_v49 = vmul.f32 %v1832_v44, %v876_v38  ;;  %1754 = vmatpush3.bf16.msra.mxu0 %v1822_v34 }
 0x201   : > { %v901_v51 = vsel %vm824_vm9, %v885_v41, 0.0 }
 0x202   : > { %v1834_v52 = vpop.eup %1833  ;;  %v898_v53 = vsel %vm824_vm9, %v884_v49, 0.0 }
 0x203   : > { %v1836_v47 = vpop.eup %1835  ;;  %902 = vadd.xlane.f32.xlu1 %v901_v51  ;;  %899 = vadd.xlane.f32.xlu0 %v898_v53  ;;  %v887_v54 = vmul.f32 %v1834_v52, %v879_v42 }
 0x204   : > { %v886_v56 = vmul.f32 %v1836_v47, %v878_v50 }
 0x205   : > { %v907_v57 = vsel %vm824_vm9, %v887_v54, 0.0 }
 0x206   : > { %v1838_v59 = vpop.eup %1837  ;;  %v904_v58 = vsel %vm824_vm9, %v886_v56, 0.0 }
 0x207   : > { %908 = vadd.xlane.f32.xlu1 %v907_v57  ;;  %905 = vadd.xlane.f32.xlu0 %v904_v58  ;;  %v888_v62 = vmul.f32 %v1838_v59, %v880_v55  ;;  %v1644_v59 = vld [vmem:[%s2294_s8] ss:$0 sm:$0xff] }
 0x209   : > { %v910_v60 = vsel %vm824_vm9, %v888_v62, 0.0 }
 0x20b   : > { %911 = vadd.xlane.f32.xlu0 %v910_v60 }
 0x283   : > { %v891_v61 = vpop.xlane.xlu1 %890 }
 0x284   : > { %v913_v63 = vmax.f32 %v891_v61, 1e-20 }
 0x286   : > { %1839 = vrcp.f32 %v913_v63 }
 0x287   : > { %v894_v0 = vpop.xlane.xlu0 %893 }
 0x288   : > { %v897_v1 = vpop.xlane.xlu1 %896  ;;  %v914_v2 = vmax.f32 %v894_v0, 1e-20 }
 0x289   : > { %v915_v3 = vmax.f32 %v897_v1, 1e-20 }
 0x28a   : > { %1841 = vrcp.f32 %v914_v2 }
 0x28b   : > { %1843 = vrcp.f32 %v915_v3 }
 0x28c   : > { %v903_v7 = vpop.xlane.xlu1 %902  ;;  %v900_v48 = vpop.xlane.xlu0 %899 }
 0x28d   : > { %v916_v4 = vmax.f32 %v900_v48, 1e-20  ;;  %v917_v5 = vmax.f32 %v903_v7, 1e-20 }
 0x28f   : > { %1845 = vrcp.f32 %v916_v4 }
 0x290   : > { %v909_v6 = vpop.xlane.xlu1 %908  ;;  %v906_v8 = vpop.xlane.xlu0 %905  ;;  %1847 = vrcp.f32 %v917_v5  ;;  %v1651_v5 = vld [vmem:[%s2294_s8 + $0x1] ss:$0 sm:$0xff] }
 0x291   : > { %v919_v9 = vmax.f32 %v909_v6, 1e-20  ;;  %v918_v10 = vmax.f32 %v906_v8, 1e-20 }
 0x293   : > { %1849 = vrcp.f32 %v918_v10  ;;  %v1840_v12 = vpop.eup %1839 }
 0x294   : > { %v912_v11 = vpop.xlane.xlu0 %911  ;;  %1851 = vrcp.f32 %v919_v9  ;;  %v922_v15 = vmul.f32 %v1840_v12, %v2104_v30 }
 0x295   : > { %v920_v13 = vmax.f32 %v912_v11, 1e-20 }
 0x297   : > { %v1842_v14 = vpop.eup %1841  ;;  %1853 = vrcp.f32 %v920_v13 }
 0x298   : > { %v924_v16 = vmul.f32 %v1842_v14, %v882_v43  ;;  %v1844_v19 = vpop.eup %1843 }
 0x299   : > { %v926_v22 = vmul.f32 %v1844_v19, %v883_v37  ;;  %v1639_v37 = vld [vmem:[%s439_s27] ss:$0 sm:$0xff] }
 0x29a   : > { %v937_v18 = vpack.c.bf16 %v924_v16, %v922_v15 }
 0x29c   : > { %1743 = vmatprep.mubr.msk.bf16.mxu1 %vm824_vm9, %v937_v18  ;;  %v1846_v20 = vpop.eup %1845 }
 0x29d   : > { %v928_v17 = vmul.f32 %v1846_v20, %v884_v49  ;;  %v1848_v23 = vpop.eup %1847 }
 0x29e   : > { %v930_v26 = vmul.f32 %v1848_v23, %v885_v41 }
 0x29f   : > { %v938_v24 = vpack.c.bf16 %v928_v17, %v926_v22 }
 0x2a0   : > { %v1850_v25 = vpop.eup %1849 }
 0x2a1   : > { %v1852_v21 = vpop.eup %1851  ;;  %1744 = vmatmul.mubr.msk.bf16.vlgmr.msra.gmra.mxu1 %vm824_vm9, %v938_v24  ;;  %v932_v27 = vmul.f32 %v1850_v25, %v886_v56 }
 0x2a2   : > { %v934_v31 = vmul.f32 %v1852_v21, %v887_v54  ;;  %1775 = vmatpush3.bf16.msra.mxu1 %v1821_v33 }
 0x2a3   : > { %v939_v29 = vpack.c.bf16 %v932_v27, %v930_v26  ;;  %1774 = vmatprep.subr.bf16.mxu1 %v1822_v34 }
 0x2a4   : > { %v1854_v28 = vpop.eup %1853 }
 0x2a5   : > { %v936_v30 = vmul.f32 %v1854_v28, %v888_v62  ;;  %1747 = vmatprep.mubr.msk.bf16.mxu1 %vm824_vm9, %v939_v29 }
 0x2a6   : > { %1776 = vmatpush3.bf16.msra.mxu1 %v1822_v34 }
 0x2a7   : > { %v940_v32 = vpack.c.bf16 %v936_v30, %v934_v31 }
 0x2a9   : > { %1748 = vmatmul.mubr.msk.bf16.gmra.mxu1 %vm824_vm9, %v940_v32  ;;  %vm1053_vm9 = vcmask 261120  }
 0x361   : > { %v1745_v35 = vpop.f32.mrf.mxu1 }
 0x362   : > { %v2143_v44 = vadd.f32 %v1745_v35, %v1639_v37 }
 0x363   : > { %v997_v43 = vpop.f32.mrf.mxu1 }
 0x364   : > { %v2139_v40 = vadd.f32 %v1639_v37, %v997_v43 }
 0x365   : > { %v1746_v36 = vpop.f32.mrf.mxu1 }
 0x366   : > { %v2137_v38 = vadd.f32 %v1746_v36, %v1639_v37 }
 0x367   : > { %v1000_v39 = vpop.f32.mrf.mxu1 }
 0x368   : > { %v2141_v46 = vadd.f32 %v1639_v37, %v1000_v39  ;;  %v1033_v49 = vpack.c.bf16 %v2137_v38, %v2143_v44 }
 0x369   : > { %v1749_v41 = vpop.f32.mrf.mxu1 }
 0x36a   : > { %v1032_v42 = vpack.c.bf16 %v2141_v46, %v2139_v40  ;;  %v2157_v55 = vadd.f32 %v1749_v41, %v1639_v37 }
 0x36b   : > { %v1013_v50 = vpop.f32.mrf.mxu1 }
 0x36c   : > { %1755 = vmatprep.mubr.msk.bf16.mxu0 %vm1053_vm9, %v1032_v42  ;;  %v2153_v47 = vadd.f32 %v1639_v37, %v1013_v50 }
 0x36d   : > { %v1750_v51 = vpop.f32.mrf.mxu1  ;;  %1756 = vmatmul.mubr.msk.bf16.vlgmr.msra.gmra.mxu0 %vm1053_vm9, %v1033_v49 }
 0x36e   : > { %v2151_v52 = vadd.f32 %v1750_v51, %v1639_v37 }
 0x36f   : > { %v1016_v53 = vpop.f32.mrf.mxu1 }
 0x370   : > { %v2155_v54 = vadd.f32 %v1639_v37, %v1016_v53  ;;  %v1035_v57 = vpack.c.bf16 %v2151_v52, %v2157_v55 }
 0x372   : > { %v1034_v56 = vpack.c.bf16 %v2155_v54, %v2153_v47 }
 0x374   : > { %1759 = vmatprep.mubr.msk.bf16.mxu1 %vm1053_vm9, %v1034_v56 }
 0x375   : > { %1760 = vmatmul.mubr.msk.bf16.vlgmr.msra.gmra.mxu1 %vm1053_vm9, %v1035_v57 }
 0x42d   : > { %v1757_v58 = vpop.f32.mrf.mxu0 }
 0x42e   : > { %v1109_v62 = vadd.f32 %v1757_v58, %v1644_v59 }
 0x42f   : > { %v1100_v60 = vpop.f32.mrf.mxu0 }
 0x430   : > { %v1141_v61 = vmul.f32 0.2, %v1109_v62  ;;  %v1101_v63 = vadd.f32 %v1644_v59, %v1100_v60  ;;  %vm1133_vm13 = vcmp.gt.f32.partialorder %v1109_v62, 0.0 }
 0x431   : > { %v1758_v0 = vpop.f32.mrf.mxu0 }
 0x432   : > { %vm1131_vm14 = vcmp.gt.f32.partialorder %v1101_v63, 0.0  ;;  %v1139_v1 = vmul.f32 0.2, %v1101_v63  ;;  %v1112_v2 = vadd.f32 %v1758_v0, %v1644_v59  ;;  %v1149_v6 = vsel %vm1133_vm13, %v1109_v62, %v1141_v61 }
 0x433   : > { %v1103_v3 = vpop.f32.mrf.mxu0  ;;  %v1162_v14 = vmul.f32 %v1651_v5, %v1149_v6 }
 0x434   : > { %v1142_v7 = vmul.f32 0.2, %v1112_v2  ;;  %v1104_v48 = vadd.f32 %v1644_v59, %v1103_v3  ;;  %v1147_v4 = vsel %vm1131_vm14, %v1101_v63, %v1139_v1  ;;  %vm1134_vm15 = vcmp.gt.f32.partialorder %v1112_v2, 0.0 }
 0x435   : > { %v1761_v8 = vpop.f32.mrf.mxu1  ;;  %v1160_v9 = vmul.f32 %v1651_v5, %v1147_v4  ;;  %v1174_v21 = vsel %vm1053_vm9, %v1162_v14, 0.0 }
 0x436   : > { %vm1132_vm1 = vcmp.gt.f32.partialorder %v1104_v48, 0.0  ;;  %v1140_v10 = vmul.f32 0.2, %v1104_v48  ;;  %v1125_v11 = vadd.f32 %v1761_v8, %v1644_v59  ;;  %v1150_v19 = vsel %vm1134_vm15, %v1112_v2, %v1142_v7 }
 0x437   : > { %v1116_v12 = vpop.f32.mrf.mxu1  ;;  %v1168_v13 = vsel %vm1053_vm9, %v1160_v9, 0.0  ;;  %v1163_v26 = vmul.f32 %v1651_v5, %v1150_v19 }
 0x438   : > { %v1145_v15 = vmul.f32 0.2, %v1125_v11  ;;  %v1117_v16 = vadd.f32 %v1644_v59, %v1116_v12  ;;  %1169 = vadd.xlane.f32.xlu1 %v1168_v13  ;;  %v1148_v18 = vsel %vm1132_vm1, %v1104_v48, %v1140_v10  ;;  %vm1137_vm2 = vcmp.gt.f32.partialorder %v1125_v11, 0.0 }
 0x439   : > { %v1762_v20 = vpop.f32.mrf.mxu1  ;;  %v1161_v22 = vmul.f32 %v1651_v5, %v1148_v18  ;;  %v1177_v33 = vsel %vm1053_vm9, %v1163_v26, 0.0 }
 0x43a   : > { %vm1135_vm3 = vcmp.gt.f32.partialorder %v1117_v16, 0.0  ;;  %v1143_v17 = vmul.f32 0.2, %v1117_v16  ;;  %v1128_v23 = vadd.f32 %v1762_v20, %v1644_v59  ;;  %v1153_v31 = vsel %vm1137_vm2, %v1125_v11, %v1145_v15 }
 0x43b   : > { %v1119_v24 = vpop.f32.mrf.mxu1  ;;  %v1171_v25 = vsel %vm1053_vm9, %v1161_v22, 0.0  ;;  %v1166_v35 = vmul.f32 %v1651_v5, %v1153_v31 }
 0x43c   : > { %v1146_v27 = vmul.f32 0.2, %v1128_v23  ;;  %v1120_v28 = vadd.f32 %v1644_v59, %v1119_v24  ;;  %1172 = vadd.xlane.f32.xlu0 %v1171_v25  ;;  %1175 = vadd.xlane.f32.xlu1 %v1174_v21  ;;  %v1151_v29 = vsel %vm1135_vm3, %v1117_v16, %v1143_v17  ;;  %vm1138_vm4 = vcmp.gt.f32.partialorder %v1128_v23, 0.0 }
 0x43d   : > { %v1164_v30 = vmul.f32 %v1651_v5, %v1151_v29  ;;  %v1186_v41 = vsel %vm1053_vm9, %v1166_v35, 0.0 }
 0x43e   : > { %vm1136_vm5 = vcmp.gt.f32.partialorder %v1120_v28, 0.0  ;;  %v1144_v32 = vmul.f32 0.2, %v1120_v28  ;;  %v1154_v36 = vsel %vm1138_vm4, %v1128_v23, %v1146_v27 }
 0x43f   : > { %v1180_v34 = vsel %vm1053_vm9, %v1164_v30, 0.0  ;;  %v1167_v42 = vmul.f32 %v1651_v5, %v1154_v36 }
 0x440   : > { %1178 = vadd.xlane.f32.xlu0 %v1177_v33  ;;  %1181 = vadd.xlane.f32.xlu1 %v1180_v34  ;;  %v1152_v43 = vsel %vm1136_vm5, %v1120_v28, %v1144_v32 }
 0x441   : > { %v1165_v37 = vmul.f32 %v1651_v5, %v1152_v43  ;;  %v1189_v49 = vsel %vm1053_vm9, %v1167_v42, 0.0 }
 0x443   : > { %v1183_v39 = vsel %vm1053_vm9, %v1165_v37, 0.0 }
 0x444   : > { %1184 = vadd.xlane.f32.xlu0 %v1183_v39  ;;  %1187 = vadd.xlane.f32.xlu1 %v1186_v41 }
 0x448   : > { %1190 = vadd.xlane.f32.xlu0 %v1189_v49 }
 0x4c1   : > { %v1170_v50 = vpop.xlane.xlu1 %1169 }
 0x4c5   : > { %v1176_v51 = vpop.xlane.xlu1 %1175  ;;  %v1173_v53 = vpop.xlane.xlu0 %1172 }
 0x4c6   : > { %v1192_v56 = vadd.f32 %v1173_v53, %v1170_v50 }
 0x4c8   : > { %v1193_v57 = vadd.f32 %v1192_v56, %v1176_v51 }
 0x4c9   : > { %v1182_v59 = vpop.xlane.xlu1 %1181  ;;  %v1179_v58 = vpop.xlane.xlu0 %1178 }
 0x4ca   : > { %v1194_v62 = vadd.f32 %v1193_v57, %v1179_v58 }
 0x4cc   : > { %v1195_v60 = vadd.f32 %v1194_v62, %v1182_v59 }
 0x4cd   : > { %v1185_v61 = vpop.xlane.xlu0 %1184  ;;  %v1188_v0 = vpop.xlane.xlu1 %1187 }
 0x4ce   : > { %v1196_v63 = vadd.f32 %v1195_v60, %v1185_v61 }
 0x4d0   : > { %v1197_v1 = vadd.f32 %v1196_v63, %v1188_v0 }
 0x4d1   : > { %v1191_v2 = vpop.xlane.xlu0 %1190 }
 0x4d2   : > { %v1198_v3 = vadd.f32 %v1197_v1, %v1191_v2 }
 0x4d4   : > { %v1199_v7 = vrot.slane %v1198_v3, 4 }
 0x4d6   : > { %v1200_v48 = vadd.f32 %v1199_v7, %v1198_v3 }
 0x4d8   : > { %v1201_v4 = vrot.slane %v1200_v48, 2 }
 0x4da   : > { %v1202_v5 = vadd.f32 %v1201_v4, %v1200_v48 }
 0x4dc   : > { %v1203_v6 = vrot.slane %v1202_v5, 1  ;;  %1209 = sbr.rel (%p1652_p5) target bundleno = 1254 (0x4e6), region = 60 }
 0x4de   : > { %v1204_v8 = vadd.f32 %v1203_v6, %v1202_v5 }
 0x4e0   : > { %v1205_v9 = vmul.f32 0.015625, %v1204_v8 }
 0x4e1   : > { %vm1210_vm6 = vcmask 0   ;;  %1213 = vst.msk [vmem:[#allocation2] sm:$0xff] %vm1053_vm9, %v2139_v40  ;;  %1214 = vst.msk [vmem:[#allocation2 + $0x8] sm:$0xff] %vm1053_vm9, %v2141_v46  ;;  %v1896_v10 = vmov 1.0  }
 0x4e2   : > { %1215 = vst.msk [vmem:[#allocation2 + $0x10] sm:$0xff] %vm1053_vm9, %v2143_v44  ;;  %1216 = vst.msk [vmem:[#allocation2 + $0x18] sm:$0xff] %vm1053_vm9, %v2137_v38 }
 0x4e3   : > { %1217 = vst.msk [vmem:[#allocation2 + $0x20] sm:$0xff] %vm1053_vm9, %v2153_v47  ;;  %1218 = vst.msk [vmem:[#allocation2 + $0x28] sm:$0xff] %vm1053_vm9, %v2155_v54 }
 0x4e4   : > { %1219 = vst.msk [vmem:[#allocation2 + $0x30] sm:$0xff] %vm1053_vm9, %v2157_v55  ;;  %1220 = vst.msk [vmem:[#allocation2 + $0x38] sm:$0xff] %vm1053_vm9, %v2151_v52 }
 0x4e5   : > { %1211 = vst.msk [vmem:[#allocation3] sm:$0x1] %vm1210_vm6, %v1205_v9  ;;  %1212 = vst.msk [vmem:[#allocation4] sm:$0x1] %vm1210_vm6, %v1896_v10 }
 0x4e6 PF: > { %p1653_p6 = scmp.le.s32.totalorder %s1882_s30, 0 }
 0x4e8   : > { %1224 = sbr.rel (%p1653_p6) target bundleno = 1420 (0x58c), region = 64 }
 0x4ed   : > { %v1225_v11 = vld [vmem:[#allocation3] sm:$0x1]  ;;  %vm1236_vm7 = vcmask 0   ;;  %v1897_v12 = vmov 0   ;;  %v1233_v19 = vld [vmem:[#allocation4] sm:$0x1] }
 0x4ee   : > { %1855 = vset.pattern.permute.xlu0 %v1897_v12  ;;  %v1226_v13 = vmax.f32 %v1225_v11, %v1205_v9  ;;  %v1238_v21 = vld [vmem:[#allocation2] sm:$0xff]  ;;  %v1239_v26 = vld [vmem:[#allocation2 + $0x8] sm:$0xff]  ;;  %v1240_v28 = vld [vmem:[#allocation2 + $0x10] sm:$0xff] }
 0x4ef   : > { %v1241_v29 = vld [vmem:[#allocation2 + $0x18] sm:$0xff]  ;;  %v1242_v31 = vld [vmem:[#allocation2 + $0x20] sm:$0xff]  ;;  %v1243_v30 = vld [vmem:[#allocation2 + $0x28] sm:$0xff] }
 0x4f0   : > { %v1227_v14 = vsub.f32 %v1225_v11, %v1226_v13  ;;  %1296 = vst.msk [vmem:[#allocation3] sm:$0x1] %vm1236_vm7, %v1226_v13  ;;  %v1230_v15 = vsub.f32 %v1205_v9, %v1226_v13  ;;  %v1244_v32 = vld [vmem:[#allocation2 + $0x30] sm:$0xff]  ;;  %v1245_v33 = vld [vmem:[#allocation2 + $0x38] sm:$0xff] }
 0x4f2   : > { %v1228_v16 = vmul.f32 1.442695, %v1227_v14  ;;  %v1231_v18 = vmul.f32 1.442695, %v1230_v15 }
 0x4f4   : > { %1856 = vpow2.f32 %v1228_v16 }
 0x4f5   : > { %1858 = vpow2.f32 %v1231_v18 }
 0x501   : > { %v1857_v20 = vpop.eup %1856 }
 0x502   : > { %v1859_v22 = vpop.eup %1858  ;;  %v1250_v17 = vrot.slane %v1857_v20, %v2024_v45  ;;  %v1234_v23 = vmul.f32 %v1857_v20, %v1233_v19 }
 0x503   : > { %v1267_v24 = vrot.slane %v1859_v22, %v2024_v45 }
 0x504   : > { %1252 = vperm.xlu0 %1855, %v1250_v17   ;;  %v1235_v25 = vadd.f32 %v1859_v22, %v1234_v23 }
 0x506   : > { %1237 = vst.msk [vmem:[#allocation4] sm:$0x1] %vm1236_vm7, %v1235_v25 }
 0x508   : > { %1269 = vperm.xlu0 %1855, %v1267_v24  }
 0x57f   : > { %v1253_v27 = vpop.permute.xlu0 %1252 }
 0x580   : > { %v1255_v34 = vmul.f32 %v1253_v27, %v1238_v21  ;;  %v1256_v35 = vmul.f32 %v1253_v27, %v1239_v26  ;;  %v1257_v43 = vmul.f32 %v1253_v27, %v1240_v28  ;;  %v1258_v36 = vmul.f32 %v1253_v27, %v1241_v29 }
 0x581   : > { %v1259_v37 = vmul.f32 %v1253_v27, %v1242_v31  ;;  %v1260_v39 = vmul.f32 %v1253_v27, %v1243_v30  ;;  %v1261_v41 = vmul.f32 %v1253_v27, %v1244_v32  ;;  %v1262_v42 = vmul.f32 %v1253_v27, %v1245_v33 }
 0x583   : > { %v1270_v49 = vpop.permute.xlu0 %1269 }
 0x584   : > { %v1272_v50 = vmul.f32 %v1270_v49, %v2139_v40  ;;  %v1273_v51 = vmul.f32 %v1270_v49, %v2141_v46  ;;  %v1274_v53 = vmul.f32 %v1270_v49, %v2143_v44  ;;  %v1275_v56 = vmul.f32 %v1270_v49, %v2137_v38 }
 0x585   : > { %v1276_v57 = vmul.f32 %v1270_v49, %v2153_v47  ;;  %v1277_v59 = vmul.f32 %v1270_v49, %v2155_v54  ;;  %v1278_v58 = vmul.f32 %v1270_v49, %v2157_v55  ;;  %v1279_v62 = vmul.f32 %v1270_v49, %v2151_v52 }
 0x586   : > { %v1280_v60 = vadd.f32 %v1272_v50, %v1255_v34  ;;  %v1281_v61 = vadd.f32 %v1273_v51, %v1256_v35  ;;  %v1282_v63 = vadd.f32 %v1274_v53, %v1257_v43  ;;  %v1283_v0 = vadd.f32 %v1275_v56, %v1258_v36 }
 0x587   : > { %v1284_v1 = vadd.f32 %v1276_v57, %v1259_v37  ;;  %v1285_v40 = vadd.f32 %v1277_v59, %v1260_v39  ;;  %v1286_v2 = vadd.f32 %v1278_v58, %v1261_v41  ;;  %v1287_v46 = vadd.f32 %v1279_v62, %v1262_v42 }
 0x588   : > { %1288 = vst.msk [vmem:[#allocation2] sm:$0xff] %vm1053_vm9, %v1280_v60  ;;  %1289 = vst.msk [vmem:[#allocation2 + $0x8] sm:$0xff] %vm1053_vm9, %v1281_v61 }
 0x589   : > { %1290 = vst.msk [vmem:[#allocation2 + $0x10] sm:$0xff] %vm1053_vm9, %v1282_v63  ;;  %1291 = vst.msk [vmem:[#allocation2 + $0x18] sm:$0xff] %vm1053_vm9, %v1283_v0 }
 0x58a   : > { %1292 = vst.msk [vmem:[#allocation2 + $0x20] sm:$0xff] %vm1053_vm9, %v1284_v1  ;;  %1293 = vst.msk [vmem:[#allocation2 + $0x28] sm:$0xff] %vm1053_vm9, %v1285_v40 }
 0x58b   : > { %1294 = vst.msk [vmem:[#allocation2 + $0x30] sm:$0xff] %vm1053_vm9, %v1286_v2  ;;  %1295 = vst.msk [vmem:[#allocation2 + $0x38] sm:$0xff] %vm1053_vm9, %v1287_v46 }
 0x58c PF: > { %p1654_p7 = scmp.ne.s32.totalorder %s1882_s30, 1 }
 0x58e   : > { %1300 = sbr.rel (%p1654_p7) target bundleno = 1639 (0x667), region = 68 }
 0x593   : > { %v1861_v38 = vld [vmem:[%s2293_s7] sm:$0xff]   ;;  %v1898_v52 = vmov 0   ;;  %v1863_v47 = vld [vmem:[%s2291_s5 + $0x10] sm:$0xff]   ;;  %v1864_v54 = vld [vmem:[%s2291_s5 + $0x8] sm:$0xff]  }
 0x594   : > { %v1862_v44 = vld [vmem:[%s2291_s5] sm:$0xff]   ;;  %1860 = vset.pattern.permute.xlu0 %v1898_v52  ;;  %1763 = vmatprep.subr.bf16.mxu0 %v1861_v38  ;;  %v1865_v55 = vld [vmem:[%s2291_s5 + $0x18] sm:$0xff]   ;;  %v1303_v5 = vld [vmem:[#allocation2 + $0x10] sm:$0xff] }
 0x595   : > { %1777 = vmatprep.subr.bf16.mxu1 %v1861_v38  ;;  %1764 = vmatpush3.bf16.msra.mxu0 %v1861_v38  ;;  %v1655_v3 = vld [vmem:[#allocation4] ss:$0 sm:$0xff]  ;;  %v1446_v48 = vld [vmem:[%s2294_s8 + $0x3] sm:$0x1]  ;;  %v1307_v6 = vld [vmem:[#allocation2 + $0x30] sm:$0xff] }
 0x596   : > { %1778 = vmatpush3.bf16.msra.mxu1 %v1861_v38  ;;  %1765 = vmatprep.mubr.msk.bf16.mxu0 %vm492_vm0, %v1862_v44  ;;  %v1459_v8 = vsub.f32 1.0, %v1446_v48  ;;  %v1301_v9 = vld [vmem:[#allocation2] sm:$0xff]  ;;  %v1450_v12 = vrot.slane %v1446_v48, %v2024_v45  ;;  %v1304_v14 = vld [vmem:[#allocation2 + $0x18] sm:$0xff]  ;;  %v1302_v22 = vld [vmem:[#allocation2 + $0x8] sm:$0xff] }
 0x597   : > { %1769 = vmatprep.mubr.msk.bf16.mxu1 %vm492_vm0, %v1863_v47  ;;  %1316 = vperm.xlu0 %1860, %v1655_v3   ;;  %v1305_v10 = vld [vmem:[#allocation2 + $0x20] sm:$0xff]  ;;  %v1308_v15 = vld [vmem:[#allocation2 + $0x38] sm:$0xff]  ;;  %v1306_v17 = vld [vmem:[#allocation2 + $0x28] sm:$0xff] }
 0x598   : > { %1766 = vmatmul.mubr.msk.bf16.vlgmr.msra.gmra.mxu0 %vm492_vm0, %v1864_v54  ;;  %v1656_v16 = vld [vmem:[%s2294_s8 + $0x2] ss:$0 sm:$0xff]  ;;  %v1463_v20 = vrot.slane %v1459_v8, %v2024_v45 }
 0x599   : > { %1770 = vmatmul.mubr.msk.bf16.vlgmr.msra.gmra.mxu1 %vm492_vm0, %v1865_v55 }
 0x612   : > { %v1317_v7 = vpop.permute.xlu0 %1316 }
 0x613   : > { %1866 = vrcp.f32 %v1317_v7 }
 0x620   : > { %v1867_v4 = vpop.eup %1866 }
 0x621   : > { %v1322_v11 = vmul.f32 %v1867_v4, %v1303_v5  ;;  %v1326_v13 = vmul.f32 %v1867_v4, %v1307_v6  ;;  %v1320_v18 = vmul.f32 %v1867_v4, %v1301_v9  ;;  %v1324_v19 = vmul.f32 %v1867_v4, %v1305_v10 }
 0x622   : > { %v1323_v25 = vmul.f32 %v1867_v4, %v1304_v14  ;;  %v1327_v21 = vmul.f32 %v1867_v4, %v1308_v15  ;;  %v1321_v34 = vmul.f32 %v1867_v4, %v1302_v22  ;;  %v1325_v35 = vmul.f32 %v1867_v4, %v1306_v17 }
 0x623   : > { %v1453_v27 = vmul.f32 %v1450_v12, %v1322_v11  ;;  %v1457_v29 = vmul.f32 %v1450_v12, %v1326_v13  ;;  %v1451_v30 = vmul.f32 %v1450_v12, %v1320_v18  ;;  %v1455_v33 = vmul.f32 %v1450_v12, %v1324_v19 }
 0x624   : > { %v1454_v41 = vmul.f32 %v1450_v12, %v1323_v25  ;;  %v1458_v49 = vmul.f32 %v1450_v12, %v1327_v21  ;;  %v1452_v62 = vmul.f32 %v1450_v12, %v1321_v34  ;;  %v1456_v61 = vmul.f32 %v1450_v12, %v1325_v35 }
 0x658   : > { %v1767_v23 = vpop.f32.mrf.mxu0 }
 0x659   : > { %v1771_v24 = vpop.f32.mrf.mxu1  ;;  %v1424_v26 = vadd.f32 %v1767_v23, %v1656_v16 }
 0x65a   : > { %v1440_v28 = vadd.f32 %v1771_v24, %v1656_v16  ;;  %v1415_v31 = vpop.f32.mrf.mxu0 }
 0x65b   : > { %v1431_v32 = vpop.f32.mrf.mxu1  ;;  %v1466_v43 = vmul.f32 %v1463_v20, %v1424_v26  ;;  %v1416_v37 = vadd.f32 %v1656_v16, %v1415_v31 }
 0x65c   : > { %v1470_v36 = vmul.f32 %v1463_v20, %v1440_v28  ;;  %v1432_v45 = vadd.f32 %v1656_v16, %v1431_v32  ;;  %v1768_v39 = vpop.f32.mrf.mxu0 }
 0x65d   : > { %v1772_v42 = vpop.f32.mrf.mxu1  ;;  %v1474_v50 = vadd.f32 %v1466_v43, %v1453_v27  ;;  %v1464_v53 = vmul.f32 %v1463_v20, %v1416_v37  ;;  %v1427_v57 = vadd.f32 %v1768_v39, %v1656_v16 }
 0x65e   : > { %v1478_v51 = vadd.f32 %v1470_v36, %v1457_v29  ;;  %v1468_v56 = vmul.f32 %v1463_v20, %v1432_v45  ;;  %v1443_v59 = vadd.f32 %v1772_v42, %v1656_v16  ;;  %v1418_v58 = vpop.f32.mrf.mxu0 }
 0x65f   : > { %v1434_v60 = vpop.f32.mrf.mxu1  ;;  %1482 = vst.msk [vmem:[%s2295_s9 + $0x10] sm:$0xff] %vm1053_vm9, %v1474_v50  ;;  %v1472_v63 = vadd.f32 %v1464_v53, %v1451_v30  ;;  %v1419_v1 = vadd.f32 %v1656_v16, %v1418_v58  ;;  %v1467_v2 = vmul.f32 %v1463_v20, %v1427_v57 }
 0x660   : > { %1486 = vst.msk [vmem:[%s2295_s9 + $0x30] sm:$0xff] %vm1053_vm9, %v1478_v51  ;;  %v1476_v0 = vadd.f32 %v1468_v56, %v1455_v33  ;;  %v1435_v40 = vadd.f32 %v1656_v16, %v1434_v60  ;;  %v1471_v46 = vmul.f32 %v1463_v20, %v1443_v59 }
 0x661   : > { %1480 = vst.msk [vmem:[%s2295_s9] sm:$0xff] %vm1053_vm9, %v1472_v63  ;;  %v1465_v38 = vmul.f32 %v1463_v20, %v1419_v1  ;;  %v1475_v52 = vadd.f32 %v1467_v2, %v1454_v41 }
 0x662   : > { %1484 = vst.msk [vmem:[%s2295_s9 + $0x20] sm:$0xff] %vm1053_vm9, %v1476_v0  ;;  %v1469_v44 = vmul.f32 %v1463_v20, %v1435_v40  ;;  %v1479_v47 = vadd.f32 %v1471_v46, %v1458_v49 }
 0x663   : > { %v1473_v54 = vadd.f32 %v1465_v38, %v1452_v62  ;;  %1483 = vst.msk [vmem:[%s2295_s9 + $0x18] sm:$0xff] %vm1053_vm9, %v1475_v52 }
 0x664   : > { %v1477_v55 = vadd.f32 %v1469_v44, %v1456_v61  ;;  %1487 = vst.msk [vmem:[%s2295_s9 + $0x38] sm:$0xff] %vm1053_vm9, %v1479_v47 }
 0x665   : > { %1481 = vst.msk [vmem:[%s2295_s9 + $0x8] sm:$0xff] %vm1053_vm9, %v1473_v54 }
 0x666   : > { %1485 = vst.msk [vmem:[%s2295_s9 + $0x28] sm:$0xff] %vm1053_vm9, %v1477_v55 }
 0x667 PF: > { %s19_s11 = sadd.s32 1, %s1890_s11   ;;  %s2306_s30 = smov %s1886_s10 }
 0x668   : > { %p16_p8 = scmp.ge.s32.totalorder %s19_s11, 4   ;;  %s2307_s10 = smov %s2309_s12 }
 0x66a   :  { %18 = sbr.rel (!%p16_p8) target bundleno = 2 (0x2), region = 113 }

</bundles_post_ra>
